<compile_context>
chip_gen: v7x
topology: tpu7x:2x2x1
jax: 0.10.0
libtpu: 0.0.40
codegen_flags: <defaults>
</compile_context>

<pallas_src>
import jax
import jax.numpy as jnp
from jax import lax
from jax.experimental import pallas as pl
from jax.experimental.pallas import tpu as pltpu


def _round_up(x, m):
    return ((x + m - 1) // m) * m


# ----------------------------- fused Pallas kernel ---------------------------


def _make_fused_kernel(H, W, B, c_in, c_h0, c_h1):
    HW = H * W
    L = B * HW                      # B images concatenated along the lane axis

    def _im2col(img, mask_ref):
        """img: (C, L) f32, B images side by side along lanes.
        Returns (9*C, L) bf16: the 9 shifted copies stacked along the
        contraction axis, with the conv's zero-padding fused in via the
        precomputed border masks.  Lane rolls wrap across image boundaries,
        but every wrapped sample lands on a masked (border) position, so the
        masks also kill any cross-image leakage."""
        pieces = []
        for dy in range(3):
            for dx in range(3):
                tap = dy * 3 + dx
                off = (dy - 1) * W + (dx - 1)          # flat pixel offset of tap
                if off == 0:
                    sh = img
                else:
                    # out[l] = img[l + off]  (XLU lane rotation)
                    sh = pltpu.roll(img, shift=(-off) % L, axis=1)
                if tap != 4:                           # centre tap: all-ones mask
                    sh = sh * mask_ref[tap:tap + 1, :]
                pieces.append(sh)
        return jnp.concatenate(pieces, axis=0).astype(jnp.bfloat16)

    def kernel(x_ref, mask_ref, w1_ref, b1_ref, w2_ref, b2_ref,
               fc1w_ref, fc1b_ref, fc2w_ref, fc2b_ref, fc3w_ref, fc3b_ref,
               o_ref):
        # ---- conv1 (3x3, pad=1) + ReLU : one (c_h0, 9*c_in) x (9*c_in, L) matmul
        im1 = _im2col(x_ref[...], mask_ref)
        h = jnp.dot(w1_ref[...], im1, preferred_element_type=jnp.float32)
        h = jnp.maximum(h + b1_ref[...], 0.0)                    # (c_h0, L) f32

        # ---- conv2 (3x3, pad=1) + ReLU ----
        im2 = _im2col(h, mask_ref)
        h = jnp.dot(w2_ref[...], im2, preferred_element_type=jnp.float32)
        h = jnp.maximum(h + b2_ref[...], 0.0)                    # (c_h1, L) f32

        # Dropout2d(p=0.5): identity in eval/inference mode.
        # TODO(synk): train-mode stochastic dropout (pltpu.prng_*) not implemented.

        # ---- MaxPool2d(2,2): two lane rolls + max.  Only even-(row,col) pixels
        # are consumed by fc1 below, so neither the rolls' wrap-around nor
        # cross-image mixing can reach a selected value (requires even H, W).
        m = jnp.maximum(h, pltpu.roll(h, shift=L - 1, axis=1))   # p   vs p+1
        m = jnp.maximum(m, pltpu.roll(m, shift=L - W, axis=1))   # row vs row+1

        # ---- Flatten + fc1: the 2x2-pool selection and the NCHW flatten are
        # folded into fc1w_ref (c_h1, HW, 128) (zeros on non-pooled pixels).
        # A single batched MXU matmul keeps B in the M/sublane dimension for the
        # whole classifier — no per-channel store loop.
        m3 = m.reshape(c_h1, B, HW).astype(jnp.bfloat16)          # (c_h1, B, HW)
        z = lax.dot_general(m3, fc1w_ref[...],
                            dimension_numbers=(((2,), (1,)), ((0,), (0,))),
                            preferred_element_type=jnp.float32)   # (c_h1, B, 128)
        z = jnp.sum(z, axis=0)                                    # (B, 128) f32
        z = jnp.maximum(z + fc1b_ref[...], 0.0)

        # ---- fc2 + ReLU -> (Dropout = id) -> fc3 (output padded to 128 lanes)
        z = jnp.dot(z.astype(jnp.bfloat16), fc2w_ref[...],
                    preferred_element_type=jnp.float32)
        z = jnp.maximum(z + fc2b_ref[...], 0.0)
        o_ref[...] = jnp.dot(z.astype(jnp.bfloat16), fc3w_ref[...],
                             preferred_element_type=jnp.float32) + fc3b_ref[...]

    return kernel


# ----------------------------- one-time weight packing -----------------------


def prepare_packed_params(p, H, W):
    """One-time repacking of PyTorch-layout parameters for the fused kernel."""
    f32, bf16 = jnp.float32, jnp.bfloat16
    c1w, c2w = p["conv1_w"], p["conv2_w"]
    c_h0, c_in = c1w.shape[0], c1w.shape[1]
    c_h1 = c2w.shape[0]
    HW = H * W
    hp, wp = H // 2, W // 2
    n_pool = hp * wp
    d1 = p["fc1_w"].shape[1]
    d2 = p["fc2_w"].shape[1]
    out_dim = p["fc3_w"].shape[1]
    out_pad = _round_up(out_dim, 128)          # lane-dense output

    # conv weights: OIHW -> (O, 9*I), column order tap*I + i with tap = ky*3 + kx
    # (matches the im2col concat order inside the kernel).
    w1p = jnp.transpose(c1w, (0, 2, 3, 1)).reshape(c_h0, 9 * c_in).astype(bf16)
    w2p = jnp.transpose(c2w, (0, 2, 3, 1)).reshape(c_h1, 9 * c_h0).astype(bf16)

    # Fold MaxPool2d(2,2) selection + NCHW flatten into fc1:
    # fc1f[c, p, :] = fc1_w[c*n_pool + q, :] iff p is the top-left pixel of
    # pooled cell q (p = 2*(q//wp)*W + 2*(q%wp)); zero elsewhere.
    q = jnp.arange(n_pool)
    p_sel = 2 * (q // wp) * W + 2 * (q % wp)
    fc1 = p["fc1_w"].reshape(c_h1, n_pool, d1)
    fc1f = jnp.zeros((c_h1, HW, d1), f32).at[:, p_sel, :].set(fc1).astype(bf16)

    # Precomputed border-validity masks for the 9 conv taps (one image).
    py = jnp.arange(HW) // W
    px = jnp.arange(HW) % W
    masks = []
    for dy in range(3):
        for dx in range(3):
            oy, ox = dy - 1, dx - 1
            v = jnp.ones((HW,), f32)
            if oy == -1:
                v = v * (py >= 1)
            if oy == 1:
                v = v * (py <= H - 2)
            if ox == -1:
                v = v * (px >= 1)
            if ox == 1:
                v = v * (px <= W - 2)
            masks.append(v)
    mask9 = jnp.stack(masks, axis=0).astype(f32)               # (9, HW)

    fc3w = jnp.pad(p["fc3_w"], ((0, 0), (0, out_pad - out_dim))).astype(bf16)
    fc3b = jnp.pad(p["fc3_b"], (0, out_pad - out_dim)).reshape(1, out_pad)

    return dict(
        w1p=w1p, b1p=p["conv1_b"].reshape(c_h0, 1).astype(f32),
        w2p=w2p, b2p=p["conv2_b"].reshape(c_h1, 1).astype(f32),
        fc1w=fc1f, fc1b=p["fc1_b"].reshape(1, d1).astype(f32),
        fc2w=p["fc2_w"].astype(bf16), fc2b=p["fc2_b"].reshape(1, d2).astype(f32),
        fc3w=fc3w, fc3b=fc3b.astype(f32),
        mask9=mask9,
        dims=(c_in, c_h0, c_h1, out_dim, out_pad),
    )


# ----------------------------- forward wrapper -------------------------------


def tinyvgg_forward(x_nchw, prep, H, W, batch_block=8):
    # batch_block can be raised (~32-64 still fits v7x's 64 MiB VMEM in bf16);
    # 8 keeps the demo small while already amortizing per-step overhead.
    N, c_in = x_nchw.shape[0], x_nchw.shape[1]
    c_in_p, c_h0, c_h1, out_dim, out_pad = prep["dims"]
    assert c_in == c_in_p
    assert H % 2 == 0 and W % 2 == 0, "fused maxpool assumes even H, W"
    HW = H * W
    assert HW % 128 == 0, "lane-concatenated conv layout needs H*W % 128 == 0"

    B = min(batch_block, N)
    Np = _round_up(N, B)
    L = B * HW

    # NCHW -> channel-major, batch-in-lanes (c_in, N*HW): wrapper-side layout
    # plumbing so the kernel's input block is already lane-concatenated.
    x_cm = jnp.transpose(x_nchw.reshape(N, c_in, HW), (1, 0, 2)).reshape(c_in, N * HW)
    if Np != N:
        x_cm = jnp.pad(x_cm, ((0, 0), (0, (Np - N) * HW)))

    mask_b = jnp.tile(prep["mask9"], (1, B))                     # (9, B*HW)

    operands = (x_cm, mask_b,
                prep["w1p"], prep["b1p"], prep["w2p"], prep["b2p"],
                prep["fc1w"], prep["fc1b"], prep["fc2w"], prep["fc2b"],
                prep["fc3w"], prep["fc3b"])

    def _full(a):
        nd = a.ndim
        return pl.BlockSpec(a.shape, lambda g, _nd=nd: (0,) * _nd)

    in_specs = [pl.BlockSpec((c_in, L), lambda g: (0, g))] + \
               [_full(a) for a in operands[1:]]

    kernel = _make_fused_kernel(H, W, B, c_in, c_h0, c_h1)

    out = pl.pallas_call(
        kernel,
        grid=(Np // B,),
        in_specs=in_specs,
        out_specs=pl.BlockSpec((B, out_pad), lambda g: (g, 0)),
        out_shape=jax.ShapeDtypeStruct((Np, out_pad), jnp.float32),
        compiler_params=pltpu.CompilerParams(
            # One batch-of-B per grid step.  On v7x, the two TensorCores can
            # each take grid steps (needs >= 2 steps; use pltpu.CORE_PARALLEL
            # if a profile shows one idle TC).
            dimension_semantics=("parallel",),
            vmem_limit_bytes=32 * 1024 * 1024,
        ),
    )(*operands)

    return out[:N, :out_dim]


# ----------------------------- reference (pure JAX) ---------------------------


def reference_forward(x_nchw, p):
    dn = ("NCHW", "OIHW", "NCHW")
    y = jax.lax.conv_general_dilated(x_nchw, p["conv1_w"], (1, 1), "SAME",
                                     dimension_numbers=dn)
    y = jnp.maximum(y + p["conv1_b"][None, :, None, None], 0.0)
    y = jax.lax.conv_general_dilated(y, p["conv2_w"], (1, 1), "SAME",
                                     dimension_numbers=dn)
    y = jnp.maximum(y + p["conv2_b"][None, :, None, None], 0.0)
    y = jax.lax.reduce_window(y, -jnp.inf, jax.lax.max,
                              (1, 1, 2, 2), (1, 1, 2, 2), "VALID")
    f = y.reshape(y.shape[0], -1)
    h = jnp.maximum(f @ p["fc1_w"] + p["fc1_b"], 0.0)
    h = jnp.maximum(h @ p["fc2_w"] + p["fc2_b"], 0.0)
    return h @ p["fc3_w"] + p["fc3_b"]


# ----------------------------- main -------------------------------------------


if __name__ == "__main__":
    # Small shapes consistent with the module:
    # input_shape=4 channels, hidden_units=[8, 16], output_shape=10, 16x16 images.
    N, C_IN, H, W = 2, 4, 16, 16
    H0, H1, OUT = 8, 16, 10
    FEAT = H1 * (H // 2) * (W // 2)  # LazyLinear in_features = 16*8*8 = 1024

    key = jax.random.PRNGKey(0)
    ks = jax.random.split(key, 11)

    params = {
        "conv1_w": jax.random.normal(ks[0], (H0, C_IN, 3, 3), jnp.float32)
                   * (1.0 / (C_IN * 9)) ** 0.5,
        "conv1_b": jax.random.normal(ks[1], (H0,), jnp.float32) * 0.01,
        "conv2_w": jax.random.normal(ks[2], (H1, H0, 3, 3), jnp.float32)
                   * (1.0 / (H0 * 9)) ** 0.5,
        "conv2_b": jax.random.normal(ks[3], (H1,), jnp.float32) * 0.01,
        # Linear weights stored as (in, out); equivalent to torch's x @ W.T + b.
        "fc1_w": jax.random.normal(ks[4], (FEAT, 128), jnp.float32) * (1.0 / FEAT) ** 0.5,
        "fc1_b": jax.random.normal(ks[5], (128,), jnp.float32) * 0.01,
        "fc2_w": jax.random.normal(ks[6], (128, 64), jnp.float32) * (1.0 / 128) ** 0.5,
        "fc2_b": jax.random.normal(ks[7], (64,), jnp.float32) * 0.01,
        "fc3_w": jax.random.normal(ks[8], (64, OUT), jnp.float32) * (1.0 / 64) ** 0.5,
        "fc3_b": jax.random.normal(ks[9], (OUT,), jnp.float32) * 0.01,
    }

    x = jax.random.normal(ks[10], (N, C_IN, H, W), jnp.float32)

    prep = prepare_packed_params(params, H, W)      # one-time weight repacking
    logits = jax.block_until_ready(tinyvgg_forward(x, prep, H, W))
    ref = jax.block_until_ready(reference_forward(x, params))

    assert logits.shape == (N, OUT), logits.shape
    if not bool(jnp.allclose(logits, ref, atol=5e-2, rtol=5e-2)):
        raise AssertionError(
            f"Pallas output mismatch vs reference: max abs diff "
            f"{float(jnp.max(jnp.abs(logits - ref)))}")

    print("KERNEL_OK")
</pallas_src>

<mosaic_0001>
module attributes {stable_mosaic.version = 11 : i64} {
  func.func @kernel(%arg0: i32, %arg1: memref<4x512xf32, #tpu.memory_space<vmem>>, %arg2: memref<9x512xf32, #tpu.memory_space<vmem>>, %arg3: memref<8x36xbf16, #tpu.memory_space<vmem>>, %arg4: memref<8x1xf32, #tpu.memory_space<vmem>>, %arg5: memref<16x72xbf16, #tpu.memory_space<vmem>>, %arg6: memref<16x1xf32, #tpu.memory_space<vmem>>, %arg7: memref<16x256x128xbf16, #tpu.memory_space<vmem>>, %arg8: memref<1x128xf32, #tpu.memory_space<vmem>>, %arg9: memref<128x64xbf16, #tpu.memory_space<vmem>>, %arg10: memref<1x64xf32, #tpu.memory_space<vmem>>, %arg11: memref<64x128xbf16, #tpu.memory_space<vmem>>, %arg12: memref<1x128xf32, #tpu.memory_space<vmem>>, %arg13: memref<2x128xf32, #tpu.memory_space<vmem>>) attributes {dimension_semantics = [#tpu.dimension_semantics<parallel>], iteration_bounds = array<i64: 1>, scalar_prefetch = 0 : i64, scratch_operands = 0 : i64, tpu.core_type = #tpu.core_type<tc>, window_params = [{transform_indices = @transform_0, window_bounds = array<i64: 4, 512>}, {pipeline_mode = #tpu.pipeline_mode<synchronous>, transform_indices = @transform_1, window_bounds = array<i64: 9, 512>}, {pipeline_mode = #tpu.pipeline_mode<synchronous>, transform_indices = @transform_2, window_bounds = array<i64: 8, 36>}, {pipeline_mode = #tpu.pipeline_mode<synchronous>, transform_indices = @transform_3, window_bounds = array<i64: 8, 1>}, {pipeline_mode = #tpu.pipeline_mode<synchronous>, transform_indices = @transform_4, window_bounds = array<i64: 16, 72>}, {pipeline_mode = #tpu.pipeline_mode<synchronous>, transform_indices = @transform_5, window_bounds = array<i64: 16, 1>}, {pipeline_mode = #tpu.pipeline_mode<synchronous>, transform_indices = @transform_6, window_bounds = array<i64: 16, 256, 128>}, {pipeline_mode = #tpu.pipeline_mode<synchronous>, transform_indices = @transform_7, window_bounds = array<i64: 1, 128>}, {pipeline_mode = #tpu.pipeline_mode<synchronous>, transform_indices = @transform_8, window_bounds = array<i64: 128, 64>}, {pipeline_mode = #tpu.pipeline_mode<synchronous>, transform_indices = @transform_9, window_bounds = array<i64: 1, 64>}, {pipeline_mode = #tpu.pipeline_mode<synchronous>, transform_indices = @transform_10, window_bounds = array<i64: 64, 128>}, {pipeline_mode = #tpu.pipeline_mode<synchronous>, transform_indices = @transform_11, window_bounds = array<i64: 1, 128>}, {transform_indices = @transform_12, window_bounds = array<i64: 2, 128>}]} {
    %c0 = arith.constant 0 : index
    %c0_0 = arith.constant 0 : index
    %0 = vector.load %arg1[%c0, %c0_0] : memref<4x512xf32, #tpu.memory_space<vmem>>, vector<4x512xf32>
    %c17_i32 = arith.constant 17 : i32
    %1 = tpu.dynamic_rotate %0 by %c17_i32 dim 1 : vector<4x512xf32>, i32 -> vector<4x512xf32>
    %c0_1 = arith.constant 0 : index
    %c0_2 = arith.constant 0 : index
    %2 = vector.load %arg2[%c0_1, %c0_2] : memref<9x512xf32, #tpu.memory_space<vmem>>, vector<1x512xf32>
    %3 = vector.broadcast %2 : vector<1x512xf32> to vector<4x512xf32>
    %4 = arith.mulf %1, %3 : vector<4x512xf32>
    %c16_i32 = arith.constant 16 : i32
    %5 = tpu.dynamic_rotate %0 by %c16_i32 dim 1 : vector<4x512xf32>, i32 -> vector<4x512xf32>
    %c1 = arith.constant 1 : index
    %c0_3 = arith.constant 0 : index
    %6 = vector.load %arg2[%c1, %c0_3] : memref<9x512xf32, #tpu.memory_space<vmem>>, vector<1x512xf32>
    %7 = vector.broadcast %6 : vector<1x512xf32> to vector<4x512xf32>
    %8 = arith.mulf %5, %7 : vector<4x512xf32>
    %c15_i32 = arith.constant 15 : i32
    %9 = tpu.dynamic_rotate %0 by %c15_i32 dim 1 : vector<4x512xf32>, i32 -> vector<4x512xf32>
    %c2 = arith.constant 2 : index
    %c0_4 = arith.constant 0 : index
    %10 = vector.load %arg2[%c2, %c0_4] : memref<9x512xf32, #tpu.memory_space<vmem>>, vector<1x512xf32>
    %11 = vector.broadcast %10 : vector<1x512xf32> to vector<4x512xf32>
    %12 = arith.mulf %9, %11 : vector<4x512xf32>
    %c1_i32 = arith.constant 1 : i32
    %13 = tpu.dynamic_rotate %0 by %c1_i32 dim 1 : vector<4x512xf32>, i32 -> vector<4x512xf32>
    %c3 = arith.constant 3 : index
    %c0_5 = arith.constant 0 : index
    %14 = vector.load %arg2[%c3, %c0_5] : memref<9x512xf32, #tpu.memory_space<vmem>>, vector<1x512xf32>
    %15 = vector.broadcast %14 : vector<1x512xf32> to vector<4x512xf32>
    %16 = arith.mulf %13, %15 : vector<4x512xf32>
    %c511_i32 = arith.constant 511 : i32
    %17 = tpu.dynamic_rotate %0 by %c511_i32 dim 1 : vector<4x512xf32>, i32 -> vector<4x512xf32>
    %c5 = arith.constant 5 : index
    %c0_6 = arith.constant 0 : index
    %18 = vector.load %arg2[%c5, %c0_6] : memref<9x512xf32, #tpu.memory_space<vmem>>, vector<1x512xf32>
    %19 = vector.broadcast %18 : vector<1x512xf32> to vector<4x512xf32>
    %20 = arith.mulf %17, %19 : vector<4x512xf32>
    %c497_i32 = arith.constant 497 : i32
    %21 = tpu.dynamic_rotate %0 by %c497_i32 dim 1 : vector<4x512xf32>, i32 -> vector<4x512xf32>
    %c6 = arith.constant 6 : index
    %c0_7 = arith.constant 0 : index
    %22 = vector.load %arg2[%c6, %c0_7] : memref<9x512xf32, #tpu.memory_space<vmem>>, vector<1x512xf32>
    %23 = vector.broadcast %22 : vector<1x512xf32> to vector<4x512xf32>
    %24 = arith.mulf %21, %23 : vector<4x512xf32>
    %c496_i32 = arith.constant 496 : i32
    %25 = tpu.dynamic_rotate %0 by %c496_i32 dim 1 : vector<4x512xf32>, i32 -> vector<4x512xf32>
    %c7 = arith.constant 7 : index
    %c0_8 = arith.constant 0 : index
    %26 = vector.load %arg2[%c7, %c0_8] : memref<9x512xf32, #tpu.memory_space<vmem>>, vector<1x512xf32>
    %27 = vector.broadcast %26 : vector<1x512xf32> to vector<4x512xf32>
    %28 = arith.mulf %25, %27 : vector<4x512xf32>
    %c495_i32 = arith.constant 495 : i32
    %29 = tpu.dynamic_rotate %0 by %c495_i32 dim 1 : vector<4x512xf32>, i32 -> vector<4x512xf32>
    %c8 = arith.constant 8 : index
    %c0_9 = arith.constant 0 : index
    %30 = vector.load %arg2[%c8, %c0_9] : memref<9x512xf32, #tpu.memory_space<vmem>>, vector<1x512xf32>
    %31 = vector.broadcast %30 : vector<1x512xf32> to vector<4x512xf32>
    %32 = arith.mulf %29, %31 : vector<4x512xf32>
    %33 = tpu.concatenate %4, %8, %12, %16, %0, %20, %24, %28, %32 in 0 : vector<4x512xf32>, vector<4x512xf32>, vector<4x512xf32>, vector<4x512xf32>, vector<4x512xf32>, vector<4x512xf32>, vector<4x512xf32>, vector<4x512xf32>, vector<4x512xf32> -> vector<36x512xf32>
    %34 = arith.truncf %33 : vector<36x512xf32> to vector<36x512xbf16>
    %c0_10 = arith.constant 0 : index
    %c0_11 = arith.constant 0 : index
    %35 = vector.load %arg3[%c0_10, %c0_11] : memref<8x36xbf16, #tpu.memory_space<vmem>>, vector<8x36xbf16>
    %cst = arith.constant dense<0.000000e+00> : vector<8x512xf32>
    %36 = tpu.matmul %35, %34, %cst {dimension_numbers = #tpu.dot_dimension_numbers<[1], [0], [0], [1], [0, 0, 1, 1], [], []>} : vector<8x36xbf16>, vector<36x512xbf16>, vector<8x512xf32> -> vector<8x512xf32>
    %c0_12 = arith.constant 0 : index
    %c0_13 = arith.constant 0 : index
    %37 = vector.load %arg4[%c0_12, %c0_13] : memref<8x1xf32, #tpu.memory_space<vmem>>, vector<8x1xf32>
    %38 = vector.broadcast %37 : vector<8x1xf32> to vector<8x512xf32>
    %39 = arith.addf %36, %38 : vector<8x512xf32>
    %cst_14 = arith.constant 0.000000e+00 : f32
    %40 = vector.broadcast %cst_14 : f32 to vector<8x512xf32>
    %41 = arith.maximumf %39, %40 : vector<8x512xf32>
    %c17_i32_15 = arith.constant 17 : i32
    %42 = tpu.dynamic_rotate %41 by %c17_i32_15 dim 1 : vector<8x512xf32>, i32 -> vector<8x512xf32>
    %c0_16 = arith.constant 0 : index
    %c0_17 = arith.constant 0 : index
    %43 = vector.load %arg2[%c0_16, %c0_17] : memref<9x512xf32, #tpu.memory_space<vmem>>, vector<1x512xf32>
    %44 = vector.broadcast %43 : vector<1x512xf32> to vector<8x512xf32>
    %45 = arith.mulf %42, %44 : vector<8x512xf32>
    %c16_i32_18 = arith.constant 16 : i32
    %46 = tpu.dynamic_rotate %41 by %c16_i32_18 dim 1 : vector<8x512xf32>, i32 -> vector<8x512xf32>
    %c1_19 = arith.constant 1 : index
    %c0_20 = arith.constant 0 : index
    %47 = vector.load %arg2[%c1_19, %c0_20] : memref<9x512xf32, #tpu.memory_space<vmem>>, vector<1x512xf32>
    %48 = vector.broadcast %47 : vector<1x512xf32> to vector<8x512xf32>
    %49 = arith.mulf %46, %48 : vector<8x512xf32>
    %c15_i32_21 = arith.constant 15 : i32
    %50 = tpu.dynamic_rotate %41 by %c15_i32_21 dim 1 : vector<8x512xf32>, i32 -> vector<8x512xf32>
    %c2_22 = arith.constant 2 : index
    %c0_23 = arith.constant 0 : index
    %51 = vector.load %arg2[%c2_22, %c0_23] : memref<9x512xf32, #tpu.memory_space<vmem>>, vector<1x512xf32>
    %52 = vector.broadcast %51 : vector<1x512xf32> to vector<8x512xf32>
    %53 = arith.mulf %50, %52 : vector<8x512xf32>
    %c1_i32_24 = arith.constant 1 : i32
    %54 = tpu.dynamic_rotate %41 by %c1_i32_24 dim 1 : vector<8x512xf32>, i32 -> vector<8x512xf32>
    %c3_25 = arith.constant 3 : index
    %c0_26 = arith.constant 0 : index
    %55 = vector.load %arg2[%c3_25, %c0_26] : memref<9x512xf32, #tpu.memory_space<vmem>>, vector<1x512xf32>
    %56 = vector.broadcast %55 : vector<1x512xf32> to vector<8x512xf32>
    %57 = arith.mulf %54, %56 : vector<8x512xf32>
    %c511_i32_27 = arith.constant 511 : i32
    %58 = tpu.dynamic_rotate %41 by %c511_i32_27 dim 1 : vector<8x512xf32>, i32 -> vector<8x512xf32>
    %c5_28 = arith.constant 5 : index
    %c0_29 = arith.constant 0 : index
    %59 = vector.load %arg2[%c5_28, %c0_29] : memref<9x512xf32, #tpu.memory_space<vmem>>, vector<1x512xf32>
    %60 = vector.broadcast %59 : vector<1x512xf32> to vector<8x512xf32>
    %61 = arith.mulf %58, %60 : vector<8x512xf32>
    %c497_i32_30 = arith.constant 497 : i32
    %62 = tpu.dynamic_rotate %41 by %c497_i32_30 dim 1 : vector<8x512xf32>, i32 -> vector<8x512xf32>
    %c6_31 = arith.constant 6 : index
    %c0_32 = arith.constant 0 : index
    %63 = vector.load %arg2[%c6_31, %c0_32] : memref<9x512xf32, #tpu.memory_space<vmem>>, vector<1x512xf32>
    %64 = vector.broadcast %63 : vector<1x512xf32> to vector<8x512xf32>
    %65 = arith.mulf %62, %64 : vector<8x512xf32>
    %c496_i32_33 = arith.constant 496 : i32
    %66 = tpu.dynamic_rotate %41 by %c496_i32_33 dim 1 : vector<8x512xf32>, i32 -> vector<8x512xf32>
    %c7_34 = arith.constant 7 : index
    %c0_35 = arith.constant 0 : index
    %67 = vector.load %arg2[%c7_34, %c0_35] : memref<9x512xf32, #tpu.memory_space<vmem>>, vector<1x512xf32>
    %68 = vector.broadcast %67 : vector<1x512xf32> to vector<8x512xf32>
    %69 = arith.mulf %66, %68 : vector<8x512xf32>
    %c495_i32_36 = arith.constant 495 : i32
    %70 = tpu.dynamic_rotate %41 by %c495_i32_36 dim 1 : vector<8x512xf32>, i32 -> vector<8x512xf32>
    %c8_37 = arith.constant 8 : index
    %c0_38 = arith.constant 0 : index
    %71 = vector.load %arg2[%c8_37, %c0_38] : memref<9x512xf32, #tpu.memory_space<vmem>>, vector<1x512xf32>
    %72 = vector.broadcast %71 : vector<1x512xf32> to vector<8x512xf32>
    %73 = arith.mulf %70, %72 : vector<8x512xf32>
    %74 = tpu.concatenate %45, %49, %53, %57, %41, %61, %65, %69, %73 in 0 : vector<8x512xf32>, vector<8x512xf32>, vector<8x512xf32>, vector<8x512xf32>, vector<8x512xf32>, vector<8x512xf32>, vector<8x512xf32>, vector<8x512xf32>, vector<8x512xf32> -> vector<72x512xf32>
    %75 = arith.truncf %74 : vector<72x512xf32> to vector<72x512xbf16>
    %c0_39 = arith.constant 0 : index
    %c0_40 = arith.constant 0 : index
    %76 = vector.load %arg5[%c0_39, %c0_40] : memref<16x72xbf16, #tpu.memory_space<vmem>>, vector<16x72xbf16>
    %cst_41 = arith.constant dense<0.000000e+00> : vector<16x512xf32>
    %77 = tpu.matmul %76, %75, %cst_41 {dimension_numbers = #tpu.dot_dimension_numbers<[1], [0], [0], [1], [0, 0, 1, 1], [], []>} : vector<16x72xbf16>, vector<72x512xbf16>, vector<16x512xf32> -> vector<16x512xf32>
    %c0_42 = arith.constant 0 : index
    %c0_43 = arith.constant 0 : index
    %78 = vector.load %arg6[%c0_42, %c0_43] : memref<16x1xf32, #tpu.memory_space<vmem>>, vector<16x1xf32>
    %79 = vector.broadcast %78 : vector<16x1xf32> to vector<16x512xf32>
    %80 = arith.addf %77, %79 : vector<16x512xf32>
    %cst_44 = arith.constant 0.000000e+00 : f32
    %81 = vector.broadcast %cst_44 : f32 to vector<16x512xf32>
    %82 = arith.maximumf %80, %81 : vector<16x512xf32>
    %c511_i32_45 = arith.constant 511 : i32
    %83 = tpu.dynamic_rotate %82 by %c511_i32_45 dim 1 : vector<16x512xf32>, i32 -> vector<16x512xf32>
    %84 = arith.maximumf %82, %83 : vector<16x512xf32>
    %c496_i32_46 = arith.constant 496 : i32
    %85 = tpu.dynamic_rotate %84 by %c496_i32_46 dim 1 : vector<16x512xf32>, i32 -> vector<16x512xf32>
    %86 = arith.maximumf %84, %85 : vector<16x512xf32>
    %87 = vector.shape_cast %86 : vector<16x512xf32> to vector<16x2x256xf32>
    %88 = arith.truncf %87 : vector<16x2x256xf32> to vector<16x2x256xbf16>
    %c0_47 = arith.constant 0 : index
    %c0_48 = arith.constant 0 : index
    %c0_49 = arith.constant 0 : index
    %89 = vector.load %arg7[%c0_47, %c0_48, %c0_49] : memref<16x256x128xbf16, #tpu.memory_space<vmem>>, vector<16x256x128xbf16>
    %cst_50 = arith.constant dense<0.000000e+00> : vector<16x2x128xf32>
    %90 = tpu.matmul %88, %89, %cst_50 {dimension_numbers = #tpu.dot_dimension_numbers<[2], [1], [1], [2], [0, 0, 0, 1, 1, 2], [0], [0]>} : vector<16x2x256xbf16>, vector<16x256x128xbf16>, vector<16x2x128xf32> -> vector<16x2x128xf32>
    %cst_51 = arith.constant dense<0.000000e+00> : vector<2x128xf32>
    %91 = vector.multi_reduction <add>, %90, %cst_51 [0] : vector<16x2x128xf32> to vector<2x128xf32>
    %c0_52 = arith.constant 0 : index
    %c0_53 = arith.constant 0 : index
    %92 = vector.load %arg8[%c0_52, %c0_53] : memref<1x128xf32, #tpu.memory_space<vmem>>, vector<1x128xf32>
    %93 = vector.broadcast %92 : vector<1x128xf32> to vector<2x128xf32>
    %94 = arith.addf %91, %93 : vector<2x128xf32>
    %cst_54 = arith.constant 0.000000e+00 : f32
    %95 = vector.broadcast %cst_54 : f32 to vector<2x128xf32>
    %96 = arith.maximumf %94, %95 : vector<2x128xf32>
    %97 = arith.truncf %96 : vector<2x128xf32> to vector<2x128xbf16>
    %c0_55 = arith.constant 0 : index
    %c0_56 = arith.constant 0 : index
    %98 = vector.load %arg9[%c0_55, %c0_56] : memref<128x64xbf16, #tpu.memory_space<vmem>>, vector<128x64xbf16>
    %cst_57 = arith.constant dense<0.000000e+00> : vector<2x64xf32>
    %99 = tpu.matmul %97, %98, %cst_57 {dimension_numbers = #tpu.dot_dimension_numbers<[1], [0], [0], [1], [0, 0, 1, 1], [], []>} : vector<2x128xbf16>, vector<128x64xbf16>, vector<2x64xf32> -> vector<2x64xf32>
    %c0_58 = arith.constant 0 : index
    %c0_59 = arith.constant 0 : index
    %100 = vector.load %arg10[%c0_58, %c0_59] : memref<1x64xf32, #tpu.memory_space<vmem>>, vector<1x64xf32>
    %101 = vector.broadcast %100 : vector<1x64xf32> to vector<2x64xf32>
    %102 = arith.addf %99, %101 : vector<2x64xf32>
    %cst_60 = arith.constant 0.000000e+00 : f32
    %103 = vector.broadcast %cst_60 : f32 to vector<2x64xf32>
    %104 = arith.maximumf %102, %103 : vector<2x64xf32>
    %105 = arith.truncf %104 : vector<2x64xf32> to vector<2x64xbf16>
    %c0_61 = arith.constant 0 : index
    %c0_62 = arith.constant 0 : index
    %106 = vector.load %arg11[%c0_61, %c0_62] : memref<64x128xbf16, #tpu.memory_space<vmem>>, vector<64x128xbf16>
    %cst_63 = arith.constant dense<0.000000e+00> : vector<2x128xf32>
    %107 = tpu.matmul %105, %106, %cst_63 {dimension_numbers = #tpu.dot_dimension_numbers<[1], [0], [0], [1], [0, 0, 1, 1], [], []>} : vector<2x64xbf16>, vector<64x128xbf16>, vector<2x128xf32> -> vector<2x128xf32>
    %c0_64 = arith.constant 0 : index
    %c0_65 = arith.constant 0 : index
    %108 = vector.load %arg12[%c0_64, %c0_65] : memref<1x128xf32, #tpu.memory_space<vmem>>, vector<1x128xf32>
    %109 = vector.broadcast %108 : vector<1x128xf32> to vector<2x128xf32>
    %110 = arith.addf %107, %109 : vector<2x128xf32>
    %c0_66 = arith.constant 0 : index
    %c0_67 = arith.constant 0 : index
    %111 = vector.load %arg13[%c0_66, %c0_67] : memref<2x128xf32, #tpu.memory_space<vmem>>, vector<2x128xf32>
    tpu.vector_store %arg13[%c0_66, %c0_67], %110 {strides = array<i32>} : memref<2x128xf32, #tpu.memory_space<vmem>>, vector<2x128xf32>,
    return
  }
  func.func @transform_0(%arg0: i32) -> (i32, i32) {
    %c0_i32 = arith.constant 0 : i32
    %c0_i32_0 = arith.constant 0 : i32
    return %c0_i32, %arg0 : i32, i32
  }
  func.func @transform_1(%arg0: i32) -> (i32, i32) {
    %c0_i32 = arith.constant 0 : i32
    %c0_i32_0 = arith.constant 0 : i32
    %c0_i32_1 = arith.constant 0 : i32
    return %c0_i32, %c0_i32_0 : i32, i32
  }
  func.func @transform_2(%arg0: i32) -> (i32, i32) {
    %c0_i32 = arith.constant 0 : i32
    %c0_i32_0 = arith.constant 0 : i32
    %c0_i32_1 = arith.constant 0 : i32
    return %c0_i32, %c0_i32_0 : i32, i32
  }
  func.func @transform_3(%arg0: i32) -> (i32, i32) {
    %c0_i32 = arith.constant 0 : i32
    %c0_i32_0 = arith.constant 0 : i32
    %c0_i32_1 = arith.constant 0 : i32
    return %c0_i32, %c0_i32_0 : i32, i32
  }
  func.func @transform_4(%arg0: i32) -> (i32, i32) {
    %c0_i32 = arith.constant 0 : i32
    %c0_i32_0 = arith.constant 0 : i32
    %c0_i32_1 = arith.constant 0 : i32
    return %c0_i32, %c0_i32_0 : i32, i32
  }
  func.func @transform_5(%arg0: i32) -> (i32, i32) {
    %c0_i32 = arith.constant 0 : i32
    %c0_i32_0 = arith.constant 0 : i32
    %c0_i32_1 = arith.constant 0 : i32
    return %c0_i32, %c0_i32_0 : i32, i32
  }
  func.func @transform_6(%arg0: i32) -> (i32, i32, i32) {
    %c0_i32 = arith.constant 0 : i32
    %c0_i32_0 = arith.constant 0 : i32
    %c0_i32_1 = arith.constant 0 : i32
    %c0_i32_2 = arith.constant 0 : i32
    return %c0_i32, %c0_i32_0, %c0_i32_1 : i32, i32, i32
  }
  func.func @transform_7(%arg0: i32) -> (i32, i32) {
    %c0_i32 = arith.constant 0 : i32
    %c0_i32_0 = arith.constant 0 : i32
    %c0_i32_1 = arith.constant 0 : i32
    return %c0_i32, %c0_i32_0 : i32, i32
  }
  func.func @transform_8(%arg0: i32) -> (i32, i32) {
    %c0_i32 = arith.constant 0 : i32
    %c0_i32_0 = arith.constant 0 : i32
    %c0_i32_1 = arith.constant 0 : i32
    return %c0_i32, %c0_i32_0 : i32, i32
  }
  func.func @transform_9(%arg0: i32) -> (i32, i32) {
    %c0_i32 = arith.constant 0 : i32
    %c0_i32_0 = arith.constant 0 : i32
    %c0_i32_1 = arith.constant 0 : i32
    return %c0_i32, %c0_i32_0 : i32, i32
  }
  func.func @transform_10(%arg0: i32) -> (i32, i32) {
    %c0_i32 = arith.constant 0 : i32
    %c0_i32_0 = arith.constant 0 : i32
    %c0_i32_1 = arith.constant 0 : i32
    return %c0_i32, %c0_i32_0 : i32, i32
  }
  func.func @transform_11(%arg0: i32) -> (i32, i32) {
    %c0_i32 = arith.constant 0 : i32
    %c0_i32_0 = arith.constant 0 : i32
    %c0_i32_1 = arith.constant 0 : i32
    return %c0_i32, %c0_i32_0 : i32, i32
  }
  func.func @transform_12(%arg0: i32) -> (i32, i32) {
    %c0_i32 = arith.constant 0 : i32
    %c0_i32_0 = arith.constant 0 : i32
    return %arg0, %c0_i32 : i32, i32
  }
}

</mosaic_0001>

<bundles_post_ra>
// kernel: tpu_custom_call.1
= control target key start
LH: loop header
LB: loop body
LE: loop exit
PB: predicated region body
PF: predicated region fallthrough
CT: control target
= control target key end

     0   :  { %17 = vsyncpa [#allocation3], 0  ;;  %s6385_s0 = inlined_call_operand.vmem [shape: f32[4,512], index: 0, kind: input, shape index: {}]   ;;  %s6386_s1 = inlined_call_operand.vmem [shape: f32[9,512], index: 1, kind: input, shape index: {}]   ;;  %s6387_s2 = inlined_call_operand.hbm [shape: bf16[8,36], index: 2, kind: input, shape index: {}]   ;;  %s6388_s3 = inlined_call_operand.vmem [shape: f32[8,1], index: 3, kind: input, shape index: {}]   ;;  %s6389_s4 = inlined_call_operand.vmem [shape: bf16[16,72], index: 4, kind: input, shape index: {}]   ;;  %s6390_s5 = inlined_call_operand.vmem [shape: f32[16,1], index: 5, kind: input, shape index: {}]   ;;  %s6391_s6 = inlined_call_operand.hbm [shape: bf16[16,256,128], index: 6, kind: input, shape index: {}]   ;;  %s6392_s7 = inlined_call_operand.hbm [shape: f32[1,128], index: 7, kind: input, shape index: {}]   ;;  %s6393_s8 = inlined_call_operand.vmem [shape: bf16[128,64], index: 8, kind: input, shape index: {}]   ;;  %s6394_s9 = inlined_call_operand.vmem [shape: f32[1,64], index: 9, kind: input, shape index: {}]   ;;  %s6395_s10 = inlined_call_operand.vmem [shape: bf16[64,128], index: 10, kind: input, shape index: {}]   ;;  %s6396_s11 = inlined_call_operand.vmem [shape: f32[1,128], index: 11, kind: input, shape index: {}]   ;;  %s6397_s12 = inlined_call_operand.hbm [shape: f32[2,128], index: 12, kind: output, shape index: {}]  }
   0x1   :  { %18 = vsyncpa [#allocation6], 0 }
   0x2   :  { %19 = vsyncpa [#allocation4], 0  ;;  %s5249_s21 = smov [#allocation5]   ;;  %s5155_s25 = scalar_lea.hbm %s6391_s6, 32768 }
   0x3   :  { %s45_s22 = sshll.u32 %s5249_s21, 4  ;;  %p5156_p0 = scmp.ne.s32.totalorder %s6391_s6, %s5155_s25  ;;  %s46_s22 = int_to_ptr.vmem [resolvable:$true] %s45_s22 }
   0x4   :  { %p5159_p1 = scmp.lt.u32.totalorder %s5155_s25, %s6391_s6 }
   0x6   :  { %p5161_p2 = pnand %p5159_p1, %p5156_p0 }
   0x8   :  { %5164 = shalt.err (!%p5161_p2)
}
   0x9   :  { %s5165_s30 = scalar_lea.vmem %s46_s22, 32768  ;;  %p5170_p4 = scmp.lt.s32.totalorder %s46_s22, %s46_s22 }
   0xa   :  { %p5166_p3 = scmp.ne.s32.totalorder %s46_s22, %s5165_s30  ;;  %p5171_p5 = scmp.lt.s32.totalorder %s5165_s30, %s5165_s30 }
   0xc   :  { %p5172_p6 = por %p5171_p5, %p5170_p4 }
   0xe   :  { %p5173_p7 = pnand %p5172_p6, %p5166_p3 }
  0x10   :  { %5176 = shalt.err (!%p5173_p7)
}
  0x11   :  { %s5250_s13 = smov 64   ;;  %s5251_s14 = smov 4  }
  0x12   :  { %51 = dma.hbm_to_vmem [thread:$0]  %s6391_s6, 32768, %s46_s22, [#allocation6], %s5250_s13, %s5250_s13, %s5251_s14  }
  0x13   :  { %s5252_s17 = smov [#allocation2]   ;;  %s5253_s19 = smov [#allocation7]  }
  0x14   :  { %s30_s18 = sshll.u32 %s5252_s17, 4  ;;  %s58_s20 = sshll.u32 %s5253_s19, 4  ;;  %s31_s18 = int_to_ptr.vmem [resolvable:$true] %s30_s18  ;;  %s59_s20 = int_to_ptr.vmem [resolvable:$true] %s58_s20 }
  0x15   :  { %s5177_s24 = scalar_lea.hbm %s6387_s2, 64 }
  0x16   :  { %p5178_p8 = scmp.ne.s32.totalorder %s6387_s2, %s5177_s24  ;;  %p5181_p9 = scmp.lt.u32.totalorder %s5177_s24, %s6387_s2 }
  0x18   :  { %p5183_p10 = pnand %p5181_p9, %p5178_p8 }
  0x1a   :  { %5186 = shalt.err (!%p5183_p10)
}
  0x1b   :  { %s5187_s6 = scalar_lea.vmem %s31_s18, 64  ;;  %p5192_p12 = scmp.lt.s32.totalorder %s31_s18, %s31_s18 }
  0x1c   :  { %p5188_p11 = scmp.ne.s32.totalorder %s31_s18, %s5187_s6  ;;  %p5193_p13 = scmp.lt.s32.totalorder %s5187_s6, %s5187_s6 }
  0x1e   :  { %p5194_p0 = por %p5193_p13, %p5192_p12 }
  0x20   :  { %p5195_p1 = pnand %p5194_p0, %p5188_p11 }
  0x22   :  { %5198 = shalt.err (!%p5195_p1)
}
  0x23   :  { %33 = dma.hbm_to_vmem [thread:$0]  %s6387_s2, 64, %s31_s18, [#allocation3]  }
  0x24   :  { %s5199_s14 = scalar_lea.hbm %s6392_s7, 16 }
  0x25   :  { %p5200_p2 = scmp.ne.s32.totalorder %s6392_s7, %s5199_s14  ;;  %p5203_p3 = scmp.lt.u32.totalorder %s5199_s14, %s6392_s7 }
  0x27   :  { %p5205_p4 = pnand %p5203_p3, %p5200_p2 }
  0x29   :  { %5208 = shalt.err (!%p5205_p4)
}
  0x2a   :  { %s5209_s21 = scalar_lea.vmem %s59_s20, 16  ;;  %s5213_s23 = scalar_lea.vmem %s59_s20, 32 }
  0x2b   :  { %p5210_p5 = scmp.ne.s32.totalorder %s59_s20, %s5209_s21  ;;  %p5214_p6 = scmp.lt.s32.totalorder %s59_s20, %s59_s20 }
  0x2c   :  { %p5215_p7 = scmp.lt.s32.totalorder %s5213_s23, %s5209_s21 }
  0x2e   :  { %p5216_p8 = por %p5215_p7, %p5214_p6 }
  0x30   :  { %p5217_p9 = pnand %p5216_p8, %p5210_p5 }
  0x32   :  { %5220 = shalt.err (!%p5217_p9)
}
  0x33   :  { %61 = dma.hbm_to_vmem [thread:$0]  %s6392_s7, 16, %s59_s20, [#allocation6]  }
  0x34   :  { %5243 = dma.done.wait [#allocation3], 64  }
  0x35   :  { %5244 = vsyncadd [#allocation3], 4294967232 }
  0x36   :  { %5245 = dma.done.wait [#allocation6], 32784  }
  0x37   :  { %5246 = vsyncadd [#allocation6], 4294934512  ;;  %v80_v0 = vld [vmem:[%s6385_s0] sm:$0xff]  ;;  %s5254_s26 = smov 1   ;;  %s5255_s27 = smov 16   ;;  %v81_v2 = vld [vmem:[%s6385_s0 + $0x8] sm:$0xff]  ;;  %v96_v4 = vlaneseq }
  0x38   :  { %209 = vrot.lane.b32.xlu1 %v80_v0, %s5254_s26  ;;  %129 = vrot.lane.b32.xlu0 %v80_v0, %s5255_s27  ;;  %v5374_v1 = vcombine.high %v80_v0, %v80_v0  ;;  %v5383_v3 = vcombine.high %v81_v2, %v81_v2  ;;  %s5256_s7 = smov 17   ;;  %s5257_s20 = smov 15   ;;  %v5262_v8 = vmov 0   ;;  %v487_v10 = vld [vmem:[%s6388_s3] sm:$0xff]  ;;  %vm457_vm4 = vcmask 1043456  }
  0x39   :  { %s5258_s22 = smov 127   ;;  %s5259_s29 = smov 112   ;;  %v5407_v5 = vshrl.u32 %v96_v4, 7  ;;  %v5414_v6 = vand.u32 127, %v96_v4  ;;  %542 = vmatprep.mubr.bf16.mxu1 %v5262_v8  ;;  %4880 = vset.pattern.permute.xlu0 %v5262_v8  ;;  %vm497_vm9 = vcmask 1041408   ;;  %vm493_vm10 = vcmask 293888  }
  0x3a   :  { %s5260_s30 = smov 113   ;;  %s5261_s13 = smov 111   ;;  %811 = vmatprep.mubr.bf16.mxu0 %v5262_v8  ;;  %4881 = vset.pattern.permute.xlu1 %v5262_v8  ;;  %v5449_v11 = vld [vmem:[%s6386_s1 + $0x3] ss:$8 sm:$0xf]  ;;  %vm763_vm11 = vcmask 588800  }
  0x3b   :  { %6404 = vst [vmem:[#allocation12_spill] sm:$0xff] %v5407_v5  ;;  %v5417_v7 = vsub.s32 1, %v5407_v5  ;;  %v5439_v9 = vsub.s32 0, %v5407_v5  ;;  %vm217_vm0 = vcmp.lt.s32.totalorder %v5414_v6, 1  ;;  %vm137_vm1 = vcmp.lt.s32.totalorder %v5414_v6, 16 }
  0x3c   :  { %211 = vrot.lane.b32.xlu1 %v5374_v1, %s5254_s26  ;;  %131 = vrot.lane.b32.xlu0 %v5374_v1, %s5255_s27  ;;  %v5454_v12 = vld [vmem:[%s6386_s1 + $0x1] ss:$8 sm:$0xf]  ;;  %vm98_vm2 = vcmp.lt.s32.totalorder %v5414_v6, 17  ;;  %vm177_vm3 = vcmp.lt.s32.totalorder %v5414_v6, 15  ;;  %vm257_vm5 = vcmp.lt.s32.totalorder %v5414_v6, 127 }
  0x3d   :  { %v5458_v15 = vrot.slane %v5449_v11, %v5417_v7  ;;  %v5462_v16 = vrot.slane %v5454_v12, %v5417_v7  ;;  %v5479_v23 = vrot.slane %v5449_v11, %v5439_v9  ;;  %v5483_v24 = vrot.slane %v5454_v12, %v5439_v9  ;;  %v5489_v25 = vld [vmem:[%s6386_s1] ss:$8 sm:$0xf]  ;;  %v5504_v32 = vld [vmem:[%s6386_s1 + $0x2] ss:$8 sm:$0xf] }
  0x3e   :  { %v5512_v38 = vrot.slane %v5489_v25, %v5417_v7  ;;  %v5519_v41 = vrot.slane %v5504_v32, %v5417_v7  ;;  %v5531_v47 = vrot.slane %v5504_v32, %v5439_v9  ;;  %v5535_v48 = vrot.slane %v5489_v25, %v5439_v9  ;;  %v5541_v49 = vld [vmem:[%s6386_s1 + $0x5] ss:$8 sm:$0xf]  ;;  %v5558_v57 = vld [vmem:[%s6386_s1 + $0x7] ss:$8 sm:$0xf] }
  0x3f   :  { %vm337_vm6 = vcmp.lt.s32.totalorder %v5414_v6, 112  ;;  %v5566_v61 = vrot.slane %v5541_v49, %v5417_v7  ;;  %vm297_vm7 = vcmp.lt.s32.totalorder %v5414_v6, 113  ;;  %vm377_vm8 = vcmp.lt.s32.totalorder %v5414_v6, 111 }
  0x40   :  { %215 = vrot.lane.b32.xlu1 %v5383_v3, %s5254_s26  ;;  %135 = vrot.lane.b32.xlu0 %v5383_v3, %s5255_s27  ;;  %vm5266_vm12 = vmmov 0   ;;  %vm4114_vm13 = vcmask 523264  }
  0x44   :  { %90 = vrot.lane.b32.xlu1 %v5374_v1, %s5256_s7  ;;  %88 = vrot.lane.b32.xlu0 %v80_v0, %s5256_s7 }
  0x48   :  { %171 = vrot.lane.b32.xlu1 %v5374_v1, %s5257_s20  ;;  %169 = vrot.lane.b32.xlu0 %v80_v0, %s5257_s20 }
  0x4c   :  { %175 = vrot.lane.b32.xlu1 %v5383_v3, %s5257_s20  ;;  %94 = vrot.lane.b32.xlu0 %v5383_v3, %s5256_s7 }
  0x50   :  { %253 = vrot.lane.b32.xlu1 %v81_v2, %s5258_s22  ;;  %251 = vrot.lane.b32.xlu0 %v5374_v1, %s5258_s22 }
  0x54   :  { %333 = vrot.lane.b32.xlu1 %v81_v2, %s5259_s29  ;;  %331 = vrot.lane.b32.xlu0 %v5374_v1, %s5259_s29 }
  0x58   :  { %329 = vrot.lane.b32.xlu1 %v80_v0, %s5259_s29  ;;  %249 = vrot.lane.b32.xlu0 %v80_v0, %s5258_s22 }
  0x5c   :  { %293 = vrot.lane.b32.xlu1 %v81_v2, %s5260_s30  ;;  %291 = vrot.lane.b32.xlu0 %v5374_v1, %s5260_s30 }
  0x60   :  { %369 = vrot.lane.b32.xlu1 %v80_v0, %s5261_s13  ;;  %289 = vrot.lane.b32.xlu0 %v80_v0, %s5260_s30 }
  0x64   :  { %373 = vrot.lane.b32.xlu1 %v81_v2, %s5261_s13  ;;  %371 = vrot.lane.b32.xlu0 %v5374_v1, %s5261_s13 }
  0x68   :  { %213 = vrot.lane.b32.xlu1 %v81_v2, %s5254_s26  ;;  %133 = vrot.lane.b32.xlu0 %v81_v2, %s5255_s27 }
  0x6c   :  { %173 = vrot.lane.b32.xlu1 %v81_v2, %s5257_s20  ;;  %92 = vrot.lane.b32.xlu0 %v81_v2, %s5256_s7 }
  0x70   :  { %335 = vrot.lane.b32.xlu1 %v5383_v3, %s5259_s29  ;;  %255 = vrot.lane.b32.xlu0 %v5383_v3, %s5258_s22 }
  0x74   :  { %375 = vrot.lane.b32.xlu1 %v5383_v3, %s5261_s13  ;;  %295 = vrot.lane.b32.xlu0 %v5383_v3, %s5260_s30 }
  0x78   :  { %490 = vperm.xlu0 %4880, %v487_v10   ;;  %v5575_v10 = vrot.slane %v5558_v57, %v5417_v7 }
  0xaa   :  { %v210_v13 = vpop.permute.xlu1 %209  ;;  %v130_v14 = vpop.permute.xlu0 %129 }
  0xae   :  { %v5465_v17 = vpop.permute.xlu1 %211  ;;  %v5467_v18 = vpop.permute.xlu0 %131 }
  0xaf   :  { %v220_v19 = vsel %vm217_vm0, %v210_v13, %v5465_v17  ;;  %v140_v20 = vsel %vm137_vm1, %v130_v14, %v5467_v18 }
  0xb0   :  { %v246_v21 = vmul.f32 %v5458_v15, %v220_v19  ;;  %v166_v22 = vmul.f32 %v5462_v16, %v140_v20  ;;  %v5582_v20 = vsub.s32 2, %v5407_v5 }
  0xb2   :  { %v426_v26 = vrot.slane %v246_v21, 4  ;;  %v414_v27 = vrot.slane %v166_v22, 4  ;;  %v5491_v28 = vpop.permute.xlu1 %215  ;;  %v5493_v29 = vpop.permute.xlu0 %135  ;;  %v5585_v21 = vsub.s32 3, %v5407_v5 }
  0xb3   :  { %v221_v30 = vsel %vm217_vm0, %v5491_v28, %v210_v13  ;;  %v141_v31 = vsel %vm137_vm1, %v5493_v29, %v130_v14 }
  0xb4   :  { %v245_v33 = vmul.f32 %v5479_v23, %v221_v30  ;;  %v165_v34 = vmul.f32 %v5483_v24, %v141_v31  ;;  %v5598_v30 = vrot.slane %v5558_v57, %v5439_v9  ;;  %v5602_v31 = vrot.slane %v5541_v49, %v5439_v9 }
  0xb6   :  { %v425_v35 = vrot.slane %v245_v33, 4  ;;  %v413_v36 = vrot.slane %v165_v34, 4  ;;  %v5508_v37 = vpop.permute.xlu1 %90  ;;  %v89_v39 = vpop.permute.xlu0 %88 }
  0xb7   :  { %v101_v40 = vsel %vm98_vm2, %v89_v39, %v5508_v37 }
  0xb8   :  { %v126_v42 = vmul.f32 %v5512_v38, %v101_v40 }
  0xba   :  { %v5523_v43 = vpop.permute.xlu1 %171  ;;  %v170_v44 = vpop.permute.xlu0 %169  ;;  %v459_v52 = vsel %vm457_vm4, %v126_v42, %v414_v27 }
  0xbb   :  { %v180_v45 = vsel %vm177_vm3, %v170_v44, %v5523_v43 }
  0xbc   :  { %v206_v46 = vmul.f32 %v5519_v41, %v180_v45 }
  0xbe   :  { %v5543_v50 = vpop.permute.xlu1 %175  ;;  %v5545_v51 = vpop.permute.xlu0 %94  ;;  %v463_v53 = vsel %vm457_vm4, %v206_v46, %v426_v26  ;;  %v5593_v26 = vld [vmem:[%s6386_s1 + $0x6] ss:$8 sm:$0xf] }
  0xbf   :  { %v181_v54 = vsel %vm177_vm3, %v5543_v50, %v170_v44  ;;  %v102_v55 = vsel %vm98_vm2, %v5545_v51, %v89_v39  ;;  %v475_v56 = vpack.c.bf16 %v463_v53, %v459_v52  ;;  %v5618_v45 = vrot.slane %v5593_v26, %v5417_v7 }
  0xc0   :  { %v205_v58 = vmul.f32 %v5531_v47, %v181_v54  ;;  %v125_v59 = vmul.f32 %v5535_v48, %v102_v55 }
  0xc1   :  { %510 = vmatprep.subr.bf16.mxu1 %v475_v56  ;;  %v5629_v56 = vld [vmem:[%s6386_s1 + $0x20] ss:$8 sm:$0xf] }
  0xc2   :  { %v5562_v60 = vpop.permute.xlu1 %253  ;;  %v252_v62 = vpop.permute.xlu0 %251  ;;  %v458_v63 = vsel %vm457_vm4, %v125_v59, %v413_v36  ;;  %v462_v0 = vsel %vm457_vm4, %v205_v58, %v425_v35  ;;  %v5634_v59 = vrot.slane %v5593_v26, %v5439_v9 }
  0xc3   :  { %v259_v2 = vsel %vm257_vm5, %v252_v62, %v5562_v60  ;;  %v474_v4 = vpack.c.bf16 %v462_v0, %v458_v63 }
  0xc4   :  { %v286_v13 = vmul.f32 %v5566_v61, %v259_v2 }
  0xc5   :  { %511 = vmatpush1.bf16.msra.mxu1 %v474_v4 }
  0xc6   :  { %v5579_v14 = vpop.permute.xlu1 %333  ;;  %v332_v19 = vpop.permute.xlu0 %331  ;;  %v438_v33 = vrot.slane %v286_v13, 4 }
  0xc7   :  { %v339_v22 = vsel %vm337_vm6, %v332_v19, %v5579_v14 }
  0xc8   :  { %v366_v27 = vmul.f32 %v5575_v10, %v339_v22  ;;  %v467_v0 = vsel %vm457_vm4, %v5374_v1, %v438_v33  ;;  %v5649_v22 = vrot.slane %v5629_v56, %v5439_v9  ;;  %v5153_v33 = vld [vmem:[%s6385_s0] sm:$0xff]  ;;  %v5664_v9 = vrot.slane %v5449_v11, %v5582_v20 }
  0xca   :  { %v450_v34 = vrot.slane %v366_v27, 4  ;;  %v5604_v35 = vpop.permute.xlu1 %329  ;;  %v5606_v36 = vpop.permute.xlu0 %249  ;;  %v5653_v27 = vrot.slane %v5629_v56, %v5417_v7 }
  0xcb   :  { %v340_v39 = vsel %vm337_vm6, %v5604_v35, %v332_v19  ;;  %v260_v40 = vsel %vm257_vm5, %v5606_v36, %v252_v62 }
  0xcc   :  { %v365_v42 = vmul.f32 %v5598_v30, %v340_v39  ;;  %v285_v44 = vmul.f32 %v5602_v31, %v260_v40 }
  0xce   :  { %v449_v46 = vrot.slane %v365_v42, 4  ;;  %v437_v52 = vrot.slane %v285_v44, 4  ;;  %v5621_v53 = vpop.permute.xlu1 %293  ;;  %v292_v54 = vpop.permute.xlu0 %291 }
  0xcf   :  { %v299_v55 = vsel %vm297_vm7, %v292_v54, %v5621_v53 }
  0xd0   :  { %v326_v58 = vmul.f32 %v5618_v45, %v299_v55  ;;  %v5680_v55 = vrot.slane %v5454_v12, %v5582_v20 }
  0xd2   :  { %v5636_v62 = vpop.permute.xlu1 %369  ;;  %v5638_v63 = vpop.permute.xlu0 %289  ;;  %v471_v2 = vsel %vm457_vm4, %v326_v58, %v450_v34  ;;  %v466_v34 = vsel %vm457_vm4, %v5153_v33, %v437_v52  ;;  %v5684_v58 = vrot.slane %v5454_v12, %v5585_v21  ;;  %v5700_v12 = vrot.slane %v5489_v25, %v5585_v21 }
  0xd3   :  { %v300_v4 = vsel %vm297_vm7, %v5638_v63, %v292_v54  ;;  %v479_v13 = vpack.c.bf16 %v471_v2, %v467_v0  ;;  %v5674_v54 = vrot.slane %v5449_v11, %v5585_v21  ;;  %v5688_v0 = vrot.slane %v5504_v32, %v5582_v20 }
  0xd4   :  { %v325_v19 = vmul.f32 %v5634_v59, %v300_v4  ;;  %v5692_v11 = vrot.slane %v5504_v32, %v5585_v21  ;;  %v5696_v2 = vrot.slane %v5489_v25, %v5582_v20  ;;  %v5704_v33 = vrot.slane %v5558_v57, %v5582_v20 }
  0xd5   :  { %512 = vmatprep.subr.bf16.mxu1 %v479_v13 }
  0xd6   :  { %v5655_v39 = vpop.permute.xlu1 %373  ;;  %v372_v1 = vpop.permute.xlu0 %371  ;;  %v470_v40 = vsel %vm457_vm4, %v325_v19, %v449_v46  ;;  %6405 = vst [vmem:[#allocation13_spill] sm:$0xff] %v5704_v33 }
  0xd7   :  { %v379_v7 = vsel %vm377_vm8, %v372_v1, %v5655_v39  ;;  %v380_v42 = vsel %vm377_vm8, %v5636_v62, %v372_v1  ;;  %v478_v44 = vpack.c.bf16 %v470_v40, %v466_v34 }
  0xd8   :  { %v405_v46 = vmul.f32 %v5649_v22, %v380_v42  ;;  %v406_v52 = vmul.f32 %v5653_v27, %v379_v7 }
  0xd9   :  { %513 = vmatpush1.bf16.msra.mxu1 %v478_v44 }
  0xda   :  { %v482_v4 = vpack.c.bf16 %v405_v46, %v405_v46  ;;  %v483_v13 = vpack.c.bf16 %v406_v52, %v406_v52  ;;  %v214_v19 = vpop.permute.xlu1 %213  ;;  %v134_v1 = vpop.permute.xlu0 %133  ;;  %v5723_v46 = vld [vmem:[#allocation2] sm:$0xf]  ;;  %v5736_v52 = vrot.slane %v5541_v49, %v5585_v21 }
  0xdb   :  { %v218_v32 = vsel %vm217_vm0, %v214_v19, %v5491_v28  ;;  %v219_v34 = vsel %vm217_vm0, %v5465_v17, %v214_v19  ;;  %v138_v40 = vsel %vm137_vm1, %v134_v1, %v5493_v29  ;;  %v139_v25 = vsel %vm137_vm1, %v5467_v18, %v134_v1 }
  0xdc   :  { %v247_v7 = vmul.f32 %v5664_v9, %v219_v34  ;;  %v248_v42 = vmul.f32 %v5674_v54, %v218_v32  ;;  %v167_v44 = vmul.f32 %v5680_v55, %v139_v25  ;;  %v168_v28 = vmul.f32 %v5684_v58, %v138_v40  ;;  %4182 = vmatprep.subr.msk.bf16.mxu1 %vm497_vm9, %v483_v13 }
  0xdd   :  { %v499_v17 = vsel %vm497_vm9, %v482_v4, 0  ;;  %v5728_v29 = vrot.slane %v5558_v57, %v5585_v21  ;;  %v5732_v18 = vrot.slane %v5541_v49, %v5582_v20 }
  0xde   :  { %v427_v19 = vrot.slane %v247_v7, 4  ;;  %v428_v1 = vrot.slane %v248_v42, 4  ;;  %v415_v32 = vrot.slane %v167_v44, 4  ;;  %v416_v13 = vrot.slane %v168_v28, 4  ;;  %515 = vmatpush1.bf16.msra.mxu1 %v499_v17  ;;  %v174_v34 = vpop.permute.xlu1 %173  ;;  %v93_v40 = vpop.permute.xlu0 %92 }
  0xdf   :  { %6406 = vst [vmem:[#allocation14_spill] sm:$0xff] %v5728_v29  ;;  %v178_v57 = vsel %vm177_vm3, %v174_v34, %v5543_v50  ;;  %v179_v4 = vsel %vm177_vm3, %v5523_v43, %v174_v34  ;;  %v99_v49 = vsel %vm98_vm2, %v93_v40, %v5545_v51  ;;  %v100_v25 = vsel %vm98_vm2, %v5508_v37, %v93_v40 }
  0xe0   :  { %v207_v7 = vmul.f32 %v5688_v0, %v179_v4  ;;  %v208_v42 = vmul.f32 %v5692_v11, %v178_v57  ;;  %v127_v44 = vmul.f32 %v5696_v2, %v100_v25  ;;  %v128_v50 = vmul.f32 %v5700_v12, %v99_v49 }
  0xe1   :  { %4183 = vmatmul.mubr.msk.bf16.vlgmr.msra.gmra.mrb[0].mxu1 %vm493_vm10, %v5723_v46  ;;  %v5758_v43 = vrot.slane %v5629_v56, %v5582_v20  ;;  %v5762_v51 = vrot.slane %v5593_v26, %v5582_v20 }
  0xe2   :  { %v464_v37 = vsel %vm457_vm4, %v207_v7, %v427_v19  ;;  %v460_v28 = vsel %vm457_vm4, %v127_v44, %v415_v32  ;;  %v336_v17 = vpop.permute.xlu1 %335  ;;  %v256_v34 = vpop.permute.xlu0 %255  ;;  %v461_v40 = vsel %vm457_vm4, %v128_v50, %v416_v13  ;;  %v465_v57 = vsel %vm457_vm4, %v208_v42, %v428_v1  ;;  %583 = vmatprep.mubr.bf16.mxu1 %v5262_v8 }
  0xe3   :  { %6407 = vst [vmem:[#allocation15_spill] sm:$0xff] %v5758_v43  ;;  %v338_v4 = vsel %vm337_vm6, %v5579_v14, %v336_v17  ;;  %v341_v20 = vsel %vm337_vm6, %v336_v17, %v5604_v35  ;;  %v258_v19 = vsel %vm257_vm5, %v5562_v60, %v256_v34  ;;  %v261_v32 = vsel %vm257_vm5, %v256_v34, %v5606_v36 }
  0xe4   :  { %v367_v1 = vmul.f32 %v5704_v33, %v338_v4  ;;  %v368_v13 = vmul.f32 %v5728_v29, %v341_v20  ;;  %v287_v49 = vmul.f32 %v5732_v18, %v258_v19  ;;  %v288_v14 = vmul.f32 %v5736_v52, %v261_v32 }
  0xe5   :  { %v477_v25 = vpack.c.bf16 %v465_v57, %v461_v40  ;;  %v5787_v35 = vrot.slane %v5629_v56, %v5585_v21  ;;  %v476_v7 = vpack.c.bf16 %v464_v37, %v460_v28  ;;  %v5791_v60 = vrot.slane %v5593_v26, %v5585_v21 }
  0xe6   :  { %v451_v42 = vrot.slane %v367_v1, 4  ;;  %v452_v36 = vrot.slane %v368_v13, 4  ;;  %v439_v44 = vrot.slane %v287_v49, 4  ;;  %v440_v50 = vrot.slane %v288_v14, 4  ;;  %v376_v17 = vpop.permute.xlu1 %375  ;;  %v296_v34 = vpop.permute.xlu0 %295 }
  0xe7   :  { %6408 = vst [vmem:[#allocation16_spill] sm:$0xff] %v5787_v35  ;;  %551 = vmatprep.subr.bf16.mxu1 %v477_v25  ;;  %v378_v40 = vsel %vm377_vm8, %v5655_v39, %v376_v17  ;;  %v381_v56 = vsel %vm377_vm8, %v376_v17, %v5636_v62  ;;  %v298_v21 = vsel %vm297_vm7, %v5621_v53, %v296_v34  ;;  %v5154_v39 = vld [vmem:[%s6385_s0 + $0x8] sm:$0xff] }
  0xe8   :  { %v301_v26 = vsel %vm297_vm7, %v296_v34, %v5638_v63  ;;  %v407_v37 = vmul.f32 %v5758_v43, %v378_v40  ;;  %552 = vmatpush1.bf16.msra.mxu1 %v476_v7  ;;  %v327_v28 = vmul.f32 %v5762_v51, %v298_v21  ;;  %v468_v62 = vsel %vm457_vm4, %v5154_v39, %v439_v44 }
  0xe9   :  { %v328_v57 = vmul.f32 %v5791_v60, %v301_v26  ;;  %v408_v4 = vmul.f32 %v5787_v35, %v381_v56  ;;  %v469_v63 = vsel %vm457_vm4, %v5383_v3, %v440_v50 }
  0xea   :  { %v484_v53 = vpack.c.bf16 %v407_v37, %v407_v37  ;;  %v472_v20 = vsel %vm457_vm4, %v327_v28, %v451_v42  ;;  %v746_v28 = vld [vmem:[%s6390_s5] sm:$0xff] }
  0xeb   :  { %v473_v19 = vsel %vm457_vm4, %v328_v57, %v452_v36  ;;  %v480_v32 = vpack.c.bf16 %v472_v20, %v468_v62  ;;  %v485_v49 = vpack.c.bf16 %v408_v4, %v408_v4 }
  0xec   :  { %v481_v1 = vpack.c.bf16 %v473_v19, %v469_v63  ;;  %v505_v13 = vsel %vm497_vm9, %v484_v53, 0 }
  0xee   :  { %553 = vmatprep.subr.bf16.mxu1 %v481_v1 }
  0xef   :  { %554 = vmatpush1.bf16.msra.mxu1 %v480_v32 }
  0xf0   :  { %4184 = vmatprep.subr.msk.bf16.mxu1 %vm497_vm9, %v485_v49 }
  0xf3   :  { %556 = vmatpush1.bf16.msra.mxu1 %v505_v13 }
  0xf6   :  { %4185 = vmatmul.mubr.msk.bf16.vlgmr.msra.gmra.mrb[4].mxu1 %vm493_vm10, %v5723_v46 }
  0xf7   :  { %854 = vmatprep.mubr.bf16.mxu1 %v5262_v8  ;;  %v491_v14 = vpop.permute.xlu0 %490 }
 0x1b4   :  { %v544_v25 = vpop.f32.mrb[0].mxu1 }
 0x1b5   :  { %v545_v3 = vadd.f32 %v544_v25, %v491_v14  ;;  %v546_v7 = vpop.f32.mrb[1].mxu1 }
 0x1b6   :  { %v548_v42 = vpop.f32.mrb[2].mxu1  ;;  %v547_v44 = vadd.f32 %v546_v7, %v491_v14 }
 0x1b7   :  { %v5822_v36 = vmax.f32 %v545_v3, 0.0  ;;  %v549_v50 = vpop.f32.mrb[3].mxu1 }
 0x1b8   :  { %v5828_v17 = vmax.f32 %v547_v44, 0.0 }
 0x1b9   :  { %612 = vrot.lane.b32.xlu0 %v5822_v36, %s5255_s27  ;;  %596 = vrot.lane.b32.xlu1 %v5822_v36, %s5256_s7 }
 0x1bd   :  { %628 = vrot.lane.b32.xlu0 %v5822_v36, %s5257_s20  ;;  %598 = vrot.lane.b32.xlu1 %v5828_v17, %s5256_s7 }
 0x1c1   :  { %644 = vrot.lane.b32.xlu0 %v5822_v36, %s5254_s26  ;;  %614 = vrot.lane.b32.xlu1 %v5828_v17, %s5255_s27 }
 0x1c5   :  { %660 = vrot.lane.b32.xlu0 %v5822_v36, %s5258_s22  ;;  %630 = vrot.lane.b32.xlu1 %v5828_v17, %s5257_s20 }
 0x1c9   :  { %v585_v8 = vpop.f32.mrb[4].mxu1  ;;  %676 = vrot.lane.b32.xlu0 %v5822_v36, %s5260_s30  ;;  %646 = vrot.lane.b32.xlu1 %v5828_v17, %s5254_s26 }
 0x1ca   :  { %v587_v46 = vpop.f32.mrb[5].mxu1  ;;  %v586_v56 = vadd.f32 %v585_v8, %v491_v14 }
 0x1cb   :  { %v589_v34 = vpop.f32.mrb[6].mxu1  ;;  %v588_v26 = vadd.f32 %v587_v46, %v491_v14 }
 0x1cc   :  { %v590_v40 = vpop.f32.mrb[7].mxu1  ;;  %v5854_v21 = vmax.f32 %v586_v56, 0.0 }
 0x1cd   :  { %692 = vrot.lane.b32.xlu0 %v5822_v36, %s5259_s29  ;;  %662 = vrot.lane.b32.xlu1 %v5828_v17, %s5258_s22  ;;  %v5864_v37 = vmax.f32 %v588_v26, 0.0 }
 0x1d1   :  { %708 = vrot.lane.b32.xlu0 %v5822_v36, %s5261_s13  ;;  %678 = vrot.lane.b32.xlu1 %v5828_v17, %s5260_s30 }
 0x1d5   :  { %600 = vrot.lane.b32.xlu0 %v5854_v21, %s5256_s7  ;;  %694 = vrot.lane.b32.xlu1 %v5828_v17, %s5259_s29 }
 0x1d9   :  { %616 = vrot.lane.b32.xlu0 %v5854_v21, %s5255_s27  ;;  %710 = vrot.lane.b32.xlu1 %v5828_v17, %s5261_s13 }
 0x1dd   :  { %632 = vrot.lane.b32.xlu0 %v5854_v21, %s5257_s20  ;;  %602 = vrot.lane.b32.xlu1 %v5864_v37, %s5256_s7 }
 0x1e1   :  { %648 = vrot.lane.b32.xlu0 %v5854_v21, %s5254_s26  ;;  %618 = vrot.lane.b32.xlu1 %v5864_v37, %s5255_s27 }
 0x1e5   :  { %664 = vrot.lane.b32.xlu0 %v5854_v21, %s5258_s22  ;;  %634 = vrot.lane.b32.xlu1 %v5864_v37, %s5257_s20 }
 0x1e9   :  { %680 = vrot.lane.b32.xlu0 %v5854_v21, %s5260_s30  ;;  %650 = vrot.lane.b32.xlu1 %v5864_v37, %s5254_s26 }
 0x1ed   :  { %696 = vrot.lane.b32.xlu0 %v5854_v21, %s5259_s29  ;;  %666 = vrot.lane.b32.xlu1 %v5864_v37, %s5258_s22 }
 0x1f1   :  { %712 = vrot.lane.b32.xlu0 %v5854_v21, %s5261_s13  ;;  %682 = vrot.lane.b32.xlu1 %v5864_v37, %s5260_s30 }
 0x1f5   :  { %750 = vperm.xlu0 %4880, %v746_v28   ;;  %698 = vrot.lane.b32.xlu1 %v5864_v37, %s5259_s29 }
 0x1f9   :  { %714 = vrot.lane.b32.xlu1 %v5864_v37, %s5261_s13 }
 0x22b   :  { %v613_v57 = vpop.permute.xlu0 %612  ;;  %v597_v39 = vpop.permute.xlu1 %596 }
 0x22f   :  { %v629_v62 = vpop.permute.xlu0 %628  ;;  %v599_v4 = vpop.permute.xlu1 %598 }
 0x230   :  { %v606_v53 = vsel %vm98_vm2, %v597_v39, %v599_v4 }
 0x231   :  { %v609_v32 = vmul.f32 %v606_v53, %v5512_v38 }
 0x233   :  { %v5899_v20 = vpop.permute.xlu0 %644  ;;  %v615_v63 = vpop.permute.xlu1 %614 }
 0x234   :  { %v622_v19 = vsel %vm137_vm1, %v613_v57, %v615_v63 }
 0x235   :  { %v625_v1 = vmul.f32 %v622_v19, %v5462_v16 }
 0x237   :  { %v5905_v13 = vpop.permute.xlu0 %660  ;;  %v631_v49 = vpop.permute.xlu1 %630  ;;  %v725_v14 = vpack.c.bf16 %v625_v1, %v609_v32 }
 0x238   :  { %v638_v19 = vsel %vm177_vm3, %v629_v62, %v631_v49 }
 0x239   :  { %779 = vmatprep.subr.bf16.mxu0 %v725_v14 }
 0x23b   :  { %v5907_v25 = vpop.permute.xlu0 %676  ;;  %v647_v3 = vpop.permute.xlu1 %646 }
 0x23c   :  { %v654_v56 = vsel %vm217_vm0, %v5899_v20, %v647_v3 }
 0x23d   :  { %v657_v5 = vmul.f32 %v654_v56, %v5458_v15 }
 0x23f   :  { %v5909_v7 = vpop.permute.xlu0 %692  ;;  %v663_v42 = vpop.permute.xlu1 %662 }
 0x243   :  { %v5911_v44 = vpop.permute.xlu0 %708  ;;  %v5913_v50 = vpop.permute.xlu1 %678 }
 0x247   :  { %v601_v8 = vpop.permute.xlu0 %600  ;;  %v695_v46 = vpop.permute.xlu1 %694 }
 0x248   :  { %v605_v32 = vsel %vm98_vm2, %v599_v4, %v601_v8 }
 0x249   :  { %v610_v15 = vmul.f32 %v605_v32, %v5696_v2  ;;  %v670_v2 = vsel %vm257_vm5, %v5905_v13, %v663_v42 }
 0x24b   :  { %v617_v38 = vpop.permute.xlu0 %616  ;;  %v5915_v34 = vpop.permute.xlu1 %710 }
 0x24c   :  { %v621_v26 = vsel %vm137_vm1, %v615_v63, %v617_v38 }
 0x24d   :  { %v626_v35 = vmul.f32 %v621_v26, %v5680_v55 }
 0x24f   :  { %v633_v16 = vpop.permute.xlu0 %632  ;;  %v603_v40 = vpop.permute.xlu1 %602 }
 0x250   :  { %v604_v28 = vsel %vm98_vm2, %v601_v8, %v603_v40  ;;  %v607_v53 = vsel %vm98_vm2, %v603_v40, %v597_v39  ;;  %v641_v8 = vmul.f32 %v638_v19, %v5519_v41 }
 0x251   :  { %v608_v39 = vmul.f32 %v607_v53, %v5535_v48  ;;  %v611_v40 = vmul.f32 %v604_v28, %v5700_v12 }
 0x252   :  { %v729_v12 = vpack.c.bf16 %v657_v5, %v641_v8 }
 0x253   :  { %v649_v1 = vpop.permute.xlu0 %648  ;;  %v619_v14 = vpop.permute.xlu1 %618 }
 0x254   :  { %v620_v63 = vsel %vm137_vm1, %v617_v38, %v619_v14  ;;  %v623_v43 = vsel %vm137_vm1, %v619_v14, %v613_v57  ;;  %v726_v38 = vpack.c.bf16 %v626_v35, %v610_v15  ;;  %v653_v57 = vsel %vm217_vm0, %v647_v3, %v649_v1 }
 0x255   :  { %v624_v29 = vmul.f32 %v623_v43, %v5483_v24  ;;  %v627_v4 = vmul.f32 %v620_v63, %v5684_v58  ;;  %v637_v24 = vsel %vm177_vm3, %v631_v49, %v633_v16 }
 0x256   :  { %v642_v49 = vmul.f32 %v637_v24, %v5688_v0  ;;  %v672_v0 = vmul.f32 %v670_v2, %v5602_v31  ;;  %v6411_v2 = vld [vmem:[#allocation15_spill] sm:$0xff] }
 0x257   :  { %v665_v56 = vpop.permute.xlu0 %664  ;;  %v635_v55 = vpop.permute.xlu1 %634  ;;  %v724_v26 = vpack.c.bf16 %v624_v29, %v608_v39  ;;  %v727_v33 = vpack.c.bf16 %v627_v4, %v611_v40  ;;  %v658_v29 = vmul.f32 %v653_v57, %v5664_v9 }
 0x258   :  { %v669_v48 = vsel %vm257_vm5, %v663_v42, %v665_v56  ;;  %v639_v41 = vsel %vm177_vm3, %v635_v55, %v629_v62  ;;  %v636_v58 = vsel %vm177_vm3, %v633_v16, %v635_v55 }
 0x259   :  { %780 = vmatpush1.bf16.msra.mxu0 %v724_v26  ;;  %822 = vmatprep.subr.bf16.mxu1 %v727_v33  ;;  %v673_v5 = vmul.f32 %v669_v48, %v5566_v61  ;;  %v640_v62 = vmul.f32 %v639_v41, %v5531_v47  ;;  %v643_v16 = vmul.f32 %v636_v58, %v5692_v11 }
 0x25a   :  { %781 = vmatprep.subr.bf16.mxu0 %v729_v12  ;;  %823 = vmatpush1.bf16.msra.mxu1 %v726_v38  ;;  %v702_v47 = vsel %vm337_vm6, %v5909_v7, %v695_v46  ;;  %v730_v11 = vpack.c.bf16 %v658_v29, %v642_v49  ;;  %v6409_v38 = vld [vmem:[#allocation13_spill] sm:$0xff] }
 0x25b   :  { %v681_v43 = vpop.permute.xlu0 %680  ;;  %v651_v35 = vpop.permute.xlu1 %650 }
 0x25c   :  { %v652_v33 = vsel %vm217_vm0, %v649_v1, %v651_v35  ;;  %v655_v3 = vsel %vm217_vm0, %v651_v35, %v5899_v20  ;;  %v685_v9 = vsel %vm297_vm7, %v5913_v50, %v681_v43  ;;  %v718_v20 = vsel %vm377_vm8, %v5911_v44, %v5915_v34 }
 0x25d   :  { %v656_v61 = vmul.f32 %v655_v3, %v5479_v23  ;;  %v659_v42 = vmul.f32 %v652_v33, %v5674_v54  ;;  %v733_v23 = vpack.c.bf16 %v673_v5, %v5828_v17  ;;  %v689_v54 = vmul.f32 %v685_v9, %v5618_v45  ;;  %v6412_v5 = vld [vmem:[#allocation16_spill] sm:$0xff] }
 0x25e   :  { %v686_v45 = vsel %vm297_vm7, %v5907_v25, %v5913_v50  ;;  %v732_v17 = vpack.c.bf16 %v672_v0, %v5822_v36  ;;  %v720_v8 = vmul.f32 %v718_v20, %v5649_v22 }
 0x25f   :  { %v697_v28 = vpop.permute.xlu0 %696  ;;  %v667_v53 = vpop.permute.xlu1 %666  ;;  %v728_v19 = vpack.c.bf16 %v656_v61, %v640_v62  ;;  %v731_v32 = vpack.c.bf16 %v659_v42, %v643_v16  ;;  %v688_v50 = vmul.f32 %v686_v45, %v5634_v59  ;;  %v4891_v45 = vld [vmem:[#allocation5 + $0xc8] sm:$0xff]  }
 0x260   :  { %v701_v31 = vsel %vm337_vm6, %v695_v46, %v697_v28  ;;  %v668_v1 = vsel %vm257_vm5, %v665_v56, %v667_v53  ;;  %v671_v14 = vsel %vm257_vm5, %v667_v53, %v5905_v13  ;;  %v704_v46 = vmul.f32 %v702_v47, %v5598_v30 }
 0x261   :  { %v705_v63 = vmul.f32 %v701_v31, %v5575_v10  ;;  %v674_v39 = vmul.f32 %v668_v1, %v5732_v18  ;;  %v675_v40 = vmul.f32 %v671_v14, %v5736_v52  ;;  %782 = vmatpush1.bf16.msra.mxu0 %v728_v19  ;;  %824 = vmatprep.subr.bf16.mxu1 %v731_v32  ;;  %v747_v31 = vld [vmem:[%s6390_s5 + $0x8] sm:$0xff] }
 0x262   :  { %783 = vmatprep.subr.bf16.mxu0 %v733_v23  ;;  %825 = vmatpush1.bf16.msra.mxu1 %v730_v11  ;;  %v740_v55 = vpack.c.bf16 %v720_v8, %v720_v8  ;;  %v4885_v1 = vld [vmem:[#allocation5 + $0x40] sm:$0xff]   ;;  %v4898_v8 = vld [vmem:[#allocation5 + $0x18] sm:$0xff]  }
 0x263   :  { %v734_v13 = vpack.c.bf16 %v674_v39, %v5854_v21  ;;  %v713_v10 = vpop.permute.xlu0 %712  ;;  %v683_v4 = vpop.permute.xlu1 %682  ;;  %v735_v18 = vpack.c.bf16 %v675_v40, %v5864_v37  ;;  %v737_v52 = vpack.c.bf16 %v705_v63, %v689_v54  ;;  %v736_v37 = vpack.c.bf16 %v704_v46, %v688_v50  ;;  %v4886_v14 = vld [vmem:[#allocation5] sm:$0xff]   ;;  %v4889_v40 = vld [vmem:[#allocation5 + $0x48] sm:$0xff]   ;;  %v4900_v50 = vld [vmem:[#allocation5 + $0x98] sm:$0xff]  }
 0x264   :  { %v717_v15 = vsel %vm377_vm8, %v5915_v34, %v713_v10  ;;  %v684_v30 = vsel %vm297_vm7, %v681_v43, %v683_v4  ;;  %v687_v36 = vsel %vm297_vm7, %v683_v4, %v5907_v25  ;;  %v6410_v25 = vld [vmem:[#allocation14_spill] sm:$0xff]  ;;  %v4887_v63 = vld [vmem:[#allocation5 + $0xc0] sm:$0xff]   ;;  %v4892_v46 = vld [vmem:[#allocation5 + $0x88] sm:$0xff]  }
 0x265   :  { %v721_v56 = vmul.f32 %v717_v15, %v5653_v27  ;;  %784 = vmatpush1.bf16.msra.mxu0 %v732_v17  ;;  %826 = vmatprep.subr.bf16.mxu1 %v735_v18  ;;  %v690_v34 = vmul.f32 %v684_v30, %v5762_v51  ;;  %v691_v26 = vmul.f32 %v687_v36, %v5791_v60  ;;  %v768_v51 = vsel %vm457_vm4, %v740_v55, 0  ;;  %v4884_v60 = vld [vmem:[%s6389_s4] sm:$0xff]   ;;  %v4890_v17 = vld [vmem:[#allocation5 + $0x8] sm:$0xff]   ;;  %v4894_v4 = vld [vmem:[#allocation5 + $0x10] sm:$0xff]  }
 0x266   :  { %785 = vmatprep.subr.bf16.mxu0 %v737_v52  ;;  %827 = vmatpush1.bf16.msra.mxu1 %v734_v13  ;;  %v4888_v39 = vld [vmem:[#allocation5 + $0x80] sm:$0xff]   ;;  %v4893_v13 = vld [vmem:[#allocation5 + $0x50] sm:$0xff]   ;;  %v4897_v52 = vld [vmem:[#allocation5 + $0x58] sm:$0xff]  }
 0x267   :  { %v741_v22 = vpack.c.bf16 %v721_v56, %v721_v56  ;;  %v699_v21 = vpop.permute.xlu1 %698  ;;  %v4896_v18 = vld [vmem:[#allocation5 + $0x90] sm:$0xff]   ;;  %v4899_v15 = vld [vmem:[#allocation5 + $0xd8] sm:$0xff]   ;;  %v4901_v56 = vld [vmem:[#allocation5 + $0x60] sm:$0xff]  }
 0x268   :  { %v700_v59 = vsel %vm337_vm6, %v697_v28, %v699_v21  ;;  %v703_v27 = vsel %vm337_vm6, %v699_v21, %v5909_v7  ;;  %v4902_v30 = vld [vmem:[#allocation5 + $0x20] sm:$0xff]   ;;  %v4905_v21 = vld [vmem:[#allocation5 + $0x68] sm:$0xff]  }
 0x269   :  { %v706_v57 = vmul.f32 %v700_v59, %v6409_v38  ;;  %v707_v48 = vmul.f32 %v703_v27, %v6410_v25  ;;  %786 = vmatpush1.bf16.msra.mxu0 %v736_v37  ;;  %v4903_v36 = vld [vmem:[#allocation5 + $0xe0] sm:$0xff]   ;;  %v4906_v37 = vld [vmem:[#allocation5 + $0x28] sm:$0xff]   ;;  %v4909_v38 = vld [vmem:[#allocation5 + $0x70] sm:$0xff]  }
 0x26a   :  { %4187 = vmatprep.subr.msk.bf16.mxu0 %vm457_vm4, %v741_v22  ;;  %v4904_v22 = vld [vmem:[#allocation5 + $0xa0] sm:$0xff]   ;;  %v4907_v59 = vld [vmem:[#allocation5 + $0xe8] sm:$0xff]   ;;  %v4910_v25 = vld [vmem:[#allocation5 + $0x30] sm:$0xff]  }
 0x26b   :  { %v738_v12 = vpack.c.bf16 %v706_v57, %v690_v34  ;;  %v715_v24 = vpop.permute.xlu1 %714  ;;  %v739_v41 = vpack.c.bf16 %v707_v48, %v691_v26  ;;  %v4908_v34 = vld [vmem:[#allocation5 + $0xa8] sm:$0xff]   ;;  %v4911_v48 = vld [vmem:[#allocation5 + $0xf0] sm:$0xff]  }
 0x26c   :  { %v716_v58 = vsel %vm377_vm8, %v713_v10, %v715_v24  ;;  %v719_v7 = vsel %vm377_vm8, %v715_v24, %v5911_v44  ;;  %v4895_v10 = vld [vmem:[#allocation5 + $0xd0] sm:$0xff]  }
 0x26d   :  { %v722_v29 = vmul.f32 %v716_v58, %v6411_v2  ;;  %v723_v43 = vmul.f32 %v719_v7, %v6412_v5  ;;  %788 = vmatpush1.bf16.msra.mxu0 %v768_v51  ;;  %828 = vmatprep.subr.bf16.mxu1 %v739_v41  ;;  %v4912_v24 = vld [vmem:[#allocation5 + $0xb0] sm:$0xff]   ;;  %v4913_v7 = vld [vmem:[#allocation5 + $0x78] sm:$0xff]  }
 0x26e   :  { %829 = vmatpush1.bf16.msra.mxu1 %v738_v12  ;;  %4463 = vmatprep.subr.bf16.mxu0 %v4885_v1  ;;  %v4914_v2 = vld [vmem:[#allocation5 + $0x38] sm:$0xff]  }
 0x26f   :  { %v742_v35 = vpack.c.bf16 %v722_v29, %v722_v29  ;;  %v743_v49 = vpack.c.bf16 %v723_v43, %v723_v43  ;;  %v4915_v29 = vld [vmem:[#allocation5 + $0xf8] sm:$0xff]  }
 0x270   :  { %4188 = vmatmul.mubr.msk.bf16.vlgmr.msra.gmra.mrb[0].mxu0 %vm763_vm11, %v4884_v60  ;;  %v4916_v5 = vld [vmem:[#allocation5 + $0xb8] sm:$0xff]  }
 0x271   :  { %4189 = vmatprep.subr.msk.bf16.mxu1 %vm457_vm4, %v743_v49  ;;  %v774_v44 = vsel %vm457_vm4, %v742_v35, 0  ;;  %4464 = vmatpush3.bf16.msra.mxu0 %v4886_v14  ;;  %v4917_v49 = vld [vmem:[#allocation5 + $0x140] sm:$0xff]  }
 0x272   :  { %831 = vmatpush1.bf16.msra.mxu1 %v774_v44  ;;  %4465 = vmatprep.subr.bf16.mxu0 %v4889_v40 }
 0x273   :  { %4485 = vmatprep.subr.bf16.mxu1 %v4887_v63  ;;  %v6413_v63 = vld [vmem:[#allocation12_spill] sm:$0xff] }
 0x274   :  { %v751_v62 = vpop.permute.xlu0 %750 }
 0x275   :  { %4190 = vmatmul.mubr.msk.bf16.vlgmr.msra.gmra.mrb[8].mxu1 %vm763_vm11, %v4884_v60  ;;  %4466 = vmatpush3.bf16.msra.mxu0 %v4890_v17 }
 0x276   :  { %4486 = vmatpush3.bf16.msra.mxu1 %v4888_v39  ;;  %4467 = vmatprep.subr.bf16.mxu0 %v4893_v13 }
 0x277   :  { %4487 = vmatprep.subr.bf16.mxu1 %v4891_v45 }
 0x279   :  { %4468 = vmatpush3.bf16.msra.mxu0 %v4894_v4 }
 0x27a   :  { %4488 = vmatpush3.bf16.msra.mxu1 %v4892_v46  ;;  %4469 = vmatprep.subr.bf16.mxu0 %v4897_v52 }
 0x27b   :  { %4489 = vmatprep.subr.bf16.mxu1 %v4895_v10 }
 0x27d   :  { %4470 = vmatpush3.bf16.msra.mxu0 %v4898_v8 }
 0x27e   :  { %4490 = vmatpush3.bf16.msra.mxu1 %v4896_v18  ;;  %4471 = vmatprep.subr.bf16.mxu0 %v4901_v56 }
 0x27f   :  { %4491 = vmatprep.subr.bf16.mxu1 %v4899_v15 }
 0x281   :  { %4472 = vmatpush3.bf16.msra.mxu0 %v4902_v30 }
 0x282   :  { %4492 = vmatpush3.bf16.msra.mxu1 %v4900_v50  ;;  %4473 = vmatprep.subr.bf16.mxu0 %v4905_v21 }
 0x283   :  { %4493 = vmatprep.subr.bf16.mxu1 %v4903_v36 }
 0x285   :  { %4474 = vmatpush3.bf16.msra.mxu0 %v4906_v37 }
 0x286   :  { %4494 = vmatpush3.bf16.msra.mxu1 %v4904_v22  ;;  %4475 = vmatprep.subr.bf16.mxu0 %v4909_v38  ;;  %v4918_v38 = vld [vmem:[#allocation5 + $0x100] sm:$0xff]  }
 0x287   :  { %4495 = vmatprep.subr.bf16.mxu1 %v4907_v59 }
 0x289   :  { %4476 = vmatpush3.bf16.msra.mxu0 %v4910_v25 }
 0x28a   :  { %4496 = vmatpush3.bf16.msra.mxu1 %v4908_v34  ;;  %4477 = vmatprep.subr.bf16.mxu0 %v4913_v7 }
 0x28b   :  { %4497 = vmatprep.subr.bf16.mxu1 %v4911_v48 }
 0x28d   :  { %4478 = vmatpush3.bf16.msra.mxu0 %v4914_v2 }
 0x28e   :  { %4498 = vmatpush3.bf16.msra.mxu1 %v4912_v24  ;;  %4507 = vmatprep.subr.bf16.mxu0 %v4917_v49  ;;  %v4920_v24 = vld [vmem:[#allocation5 + $0x180] sm:$0xff]   ;;  %v4924_v49 = vld [vmem:[#allocation5 + $0x188] sm:$0xff]  }
 0x28f   :  { %4499 = vmatprep.subr.bf16.mxu1 %v4915_v29  ;;  %v4922_v29 = vld [vmem:[#allocation5 + $0x108] sm:$0xff]  }
 0x292   :  { %4500 = vmatpush3.bf16.msra.mxu1 %v4916_v5 }
 0x343   :  { %v813_v33 = vpop.f32.mrb[0].mxu0 }
 0x344   :  { %v6032_v3 = vadd.f32 %v813_v33, %v751_v62  ;;  %v815_v16 = vpop.f32.mrb[1].mxu0 }
 0x345   :  { %v6034_v9 = vadd.f32 %v815_v16, %v751_v62  ;;  %v6036_v61 = vpop.f32.mrb[2].mxu0 }
 0x346   :  { %v865_v42 = vmax.f32 %v6032_v3, 0.0  ;;  %v6039_v0 = vpop.f32.mrb[3].mxu0 }
 0x347   :  { %v866_v47 = vmax.f32 %v6034_v9, 0.0 }
 0x348   :  { %873 = vrot.lane.b32.xlu1 %v865_v42, %s5258_s22  ;;  %v856_v20 = vpop.f32.mrb[8].mxu1 }
 0x349   :  { %v6045_v11 = vadd.f32 %v856_v20, %v751_v62  ;;  %877 = vrot.lane.b32.xlu0 %v866_v47, %s5258_s22  ;;  %v858_v28 = vpop.f32.mrb[9].mxu1 }
 0x34a   :  { %v6050_v53 = vadd.f32 %v858_v28, %v751_v62  ;;  %v6052_v19 = vpop.f32.mrb[10].mxu1  ;;  %v4919_v62 = vld [vmem:[#allocation5 + $0x1c0] sm:$0xff]  }
 0x34b   :  { %v867_v32 = vmax.f32 %v6045_v11, 0.0  ;;  %v6055_v23 = vpop.f32.mrb[11].mxu1  ;;  %4529 = vmatprep.subr.bf16.mxu1 %v4919_v62  ;;  %v5263_v11 = vmov 1983009808  }
 0x34c   :  { %v868_v54 = vmax.f32 %v6050_v53, 0.0  ;;  %v939_v28 = vunpack.c.l.s4 %v5263_v11  ;;  %v4926_v11 = vld [vmem:[#allocation5 + $0x110] sm:$0xff]  }
 0x34d   :  { %881 = vrot.lane.b32.xlu1 %v867_v32, %s5258_s22 }
 0x34e   :  { %885 = vrot.lane.b32.xlu0 %v868_v54, %s5258_s22 }
 0x351   :  { %755 = vperm.xlu1 %4881, %v747_v31  }
 0x3ba   :  { %v874_v55 = vpop.permute.xlu1 %873 }
 0x3bb   :  { %v878_v27 = vpop.permute.xlu0 %877 }
 0x3bc   :  { %v893_v26 = vsel %vm257_vm5, %v874_v55, %v878_v27 }
 0x3bd   :  { %v897_v57 = vmax.f32 %v865_v42, %v893_v26 }
 0x3bf   :  { %905 = vrot.lane.b32.xlu0 %v897_v57, %s5259_s29  ;;  %v882_v12 = vpop.permute.xlu1 %881 }
 0x3c0   :  { %v891_v41 = vsel %vm257_vm5, %v878_v27, %v882_v12  ;;  %v886_v58 = vpop.permute.xlu0 %885  ;;  %v5265_v27 = vmov 0.0  }
 0x3c1   :  { %v898_v51 = vmax.f32 %v866_v47, %v891_v41  ;;  %v889_v60 = vsel %vm257_vm5, %v882_v12, %v886_v58  ;;  %v895_v43 = vsel %vm257_vm5, %v886_v58, %v874_v55  ;;  %v4921_v41 = vld [vmem:[#allocation5 + $0x148] sm:$0xff]  }
 0x3c2   :  { %v899_v35 = vmax.f32 %v867_v32, %v889_v60  ;;  %v900_v44 = vmax.f32 %v868_v54, %v895_v43  ;;  %v5264_v32 = vmov 1934713408   ;;  %v4923_v60 = vld [vmem:[#allocation5 + $0x1c8] sm:$0xff]  }
 0x3c3   :  { %909 = vrot.lane.b32.xlu1 %v898_v51, %s5259_s29 }
 0x3c4   :  { %913 = vrot.lane.b32.xlu0 %v899_v35, %s5259_s29 }
 0x3c7   :  { %917 = vrot.lane.b32.xlu1 %v900_v44, %s5259_s29 }
 0x3d0   :  { %v756_v33 = vpop.permute.xlu1 %755 }
 0x3d1   :  { %v6088_v3 = vadd.f32 %v6039_v0, %v756_v33  ;;  %v6091_v16 = vadd.f32 %v6036_v61, %v756_v33  ;;  %v6096_v47 = vadd.f32 %v6055_v23, %v756_v33  ;;  %v6099_v20 = vadd.f32 %v6052_v19, %v756_v33  ;;  %v4927_v33 = vld [vmem:[#allocation5 + $0x1d0] sm:$0xff]  }
 0x3d2   :  { %v940_v19 = vunpack.c.0.s8 %v939_v28  ;;  %v970_v23 = vunpack.c.l.s4 %v5264_v32 }
 0x3d3   :  { %v870_v9 = vmax.f32 %v6088_v3, 0.0  ;;  %v869_v42 = vmax.f32 %v6091_v16, 0.0  ;;  %v872_v0 = vmax.f32 %v6096_v47, 0.0  ;;  %v871_v61 = vmax.f32 %v6099_v20, 0.0  ;;  %v4930_v3 = vld [vmem:[#allocation5 + $0x118] sm:$0xff]   ;;  %v4933_v20 = vld [vmem:[#allocation5 + $0x160] sm:$0xff]  }
 0x3d4   :  { %v6118_v39 = vsub.s32 %v940_v19, %v6413_v63  ;;  %v971_v40 = vunpack.c.0.s8 %v970_v23  ;;  %v4929_v19 = vld [vmem:[#allocation5 + $0x158] sm:$0xff]   ;;  %v4928_v23 = vld [vmem:[#allocation5 + $0x190] sm:$0xff]  }
 0x3d5   :  { %879 = vrot.lane.b32.xlu1 %v870_v9, %s5258_s22  ;;  %875 = vrot.lane.b32.xlu0 %v869_v42, %s5258_s22 }
 0x3d6   :  { %v6133_v52 = vsub.s32 %v971_v40, %v6413_v63  ;;  %v4937_v63 = vld [vmem:[#allocation5 + $0x168] sm:$0xff]  }
 0x3d7   :  { %v4939_v40 = vld [vmem:[#allocation5 + $0x1e8] sm:$0xff]  }
 0x3d9   :  { %887 = vrot.lane.b32.xlu1 %v872_v0, %s5258_s22  ;;  %883 = vrot.lane.b32.xlu0 %v871_v61, %s5258_s22  ;;  %s5267_s22 = smov [#allocation8]  }
 0x431   :  { %v906_v53 = vpop.permute.xlu0 %905 }
 0x435   :  { %v910_v54 = vpop.permute.xlu1 %909 }
 0x436   :  { %v925_v31 = vsel %vm337_vm6, %v906_v53, %v910_v54  ;;  %v914_v1 = vpop.permute.xlu0 %913 }
 0x437   :  { %v923_v14 = vsel %vm337_vm6, %v910_v54, %v914_v1  ;;  %v6120_v45 = vmax.f32 %v897_v57, %v925_v31  ;;  %v4931_v54 = vld [vmem:[#allocation5 + $0x1d8] sm:$0xff]   ;;  %v4935_v31 = vld [vmem:[#allocation5 + $0x1e0] sm:$0xff]  }
 0x438   :  { %v6122_v46 = vmax.f32 %v898_v51, %v923_v14  ;;  %v4934_v14 = vld [vmem:[#allocation5 + $0x120] sm:$0xff]  }
 0x439   :  { %v918_v17 = vpop.permute.xlu1 %917  ;;  %v6137_v8 = vrot.slane %v6120_v45, %v6118_v39 }
 0x43a   :  { %v921_v13 = vsel %vm337_vm6, %v914_v1, %v918_v17  ;;  %v927_v10 = vsel %vm337_vm6, %v918_v17, %v906_v53  ;;  %v1076_v56 = vrot.slane %v6122_v46, %v6118_v39  ;;  %v1069_v47 = vcombine.high %v6122_v46, %v5265_v27  ;;  %v4943_v46 = vld [vmem:[#allocation5 + $0x1f0] sm:$0xff]  }
 0x43b   :  { %v6128_v4 = vmax.f32 %v899_v35, %v921_v13  ;;  %v6130_v18 = vmax.f32 %v900_v44, %v927_v10  ;;  %v4925_v35 = vld [vmem:[#allocation5 + $0x150] sm:$0xff]   ;;  %v4938_v13 = vld [vmem:[#allocation5 + $0x128] sm:$0xff]  }
 0x43c   :  { %v4941_v10 = vld [vmem:[#allocation5 + $0x170] sm:$0xff]  }
 0x43d   :  { %v6141_v15 = vrot.slane %v6128_v4, %v6118_v39  ;;  %v1091_v50 = vrot.slane %v6130_v18, %v6118_v39  ;;  %v1084_v1 = vcombine.high %v6130_v18, %v5265_v27  ;;  %v6193_v18 = vrot.slane %v1069_v47, %v6118_v39  ;;  %v4974_v47 = vld [vmem:[#allocation5 + $0x230] sm:$0xff]  }
 0x43f   :  { %v967_v30 = vcombine.low %v6137_v8, %v6141_v15  ;;  %v1099_v36 = vcombine.low %v1076_v56, %v1091_v50  ;;  %v1100_v22 = vcombine.high %v1076_v56, %v1091_v50  ;;  %v6190_v17 = vrot.slane %v1084_v1, %v6118_v39  ;;  %v4940_v50 = vld [vmem:[#allocation5 + $0x1a8] sm:$0xff]   ;;  %v4973_v1 = vld [vmem:[#allocation5 + $0x270] sm:$0xff]  }
 0x440   :  { %v968_v56 = vcombine.high %v6137_v8, %v6141_v15  ;;  %v4949_v8 = vld [vmem:[#allocation5 + $0x240] sm:$0xff]   ;;  %v4948_v15 = vld [vmem:[#allocation5 + $0x1b8] sm:$0xff]  }
 0x441   :  { %v975_v21 = vrot.slane %v967_v30, %v6133_v52  ;;  %v1107_v37 = vrot.slane %v1099_v36, %v6133_v52  ;;  %v1114_v55 = vrot.slane %v1100_v22, %v6133_v52  ;;  %v4942_v30 = vld [vmem:[#allocation5 + $0x130] sm:$0xff]   ;;  %v1115_v36 = vcombine.low %v6193_v18, %v6190_v17  ;;  %v4945_v22 = vld [vmem:[#allocation5 + $0x178] sm:$0xff]  }
 0x443   :  { %v1201_v59 = vpack.c.bf16 %v975_v21, %v975_v21  ;;  %v999_v34 = vcombine.high %v975_v21, %v5265_v27  ;;  %v1202_v26 = vpack.c.bf16 %v1107_v37, %v1107_v37  ;;  %v1131_v57 = vcombine.high %v1107_v37, %v5265_v27  ;;  %v4944_v21 = vld [vmem:[#allocation5 + $0x1b0] sm:$0xff]  }
 0x444   :  { %v1132_v48 = vcombine.high %v1114_v55, %v5265_v27  ;;  %v1206_v7 = vpack.c.bf16 %v1114_v55, %v1114_v55  ;;  %v982_v37 = vrot.slane %v968_v56, %v6133_v52  ;;  %v4947_v55 = vld [vmem:[#allocation5 + $0x1f8] sm:$0xff]  }
 0x445   :  { %v1203_v25 = vpack.c.bf16 %v999_v34, %v999_v34  ;;  %1873 = vmatprep.mubr.bf16.mxu0 %v1202_v26  ;;  %v1204_v12 = vpack.c.bf16 %v1131_v57, %v1131_v57  ;;  %v1123_v34 = vrot.slane %v1115_v36, %v6133_v52  ;;  %v4950_v57 = vld [vmem:[#allocation5 + $0x200] sm:$0xff]   ;;  %v4978_v56 = vld [vmem:[#allocation5 + $0x238] sm:$0xff]  }
 0x446   :  { %1874 = vmatmul.mubr.bf16.vlgmr.msra.gmra.mrb[4].mxu0 %v1201_v59  ;;  %v1208_v43 = vpack.c.bf16 %v1132_v48, %v1132_v48  ;;  %v4946_v59 = vld [vmem:[#allocation5 + $0x138] sm:$0xff]   ;;  %v1000_v26 = vcombine.high %v982_v37, %v5265_v27  ;;  %v1205_v48 = vpack.c.bf16 %v982_v37, %v982_v37 }
 0x447   :  { %v876_v58 = vpop.permute.xlu0 %875  ;;  %v880_v51 = vpop.permute.xlu1 %879  ;;  %4508 = vmatpush3.bf16.msra.mxu0 %v4918_v38  ;;  %2009 = vmatprep.mubr.bf16.mxu1 %v1204_v12  ;;  %v4951_v38 = vld [vmem:[#allocation5 + $0x2c0] sm:$0xff]   ;;  %v4953_v12 = vld [vmem:[#allocation5 + $0x248] sm:$0xff]   ;;  %v4980_v36 = vld [vmem:[#allocation5 + $0x2b8] sm:$0xff]  }
 0x448   :  { %v894_v2 = vsel %vm257_vm5, %v876_v58, %v880_v51  ;;  %2145 = vmatprep.mubr.bf16.mxu0 %v1206_v7  ;;  %2010 = vmatmul.mubr.bf16.vlgmr.msra.gmra.mrb[12].mxu1 %v1203_v25  ;;  %v1133_v25 = vcombine.high %v1123_v34, %v5265_v27  ;;  %v4955_v7 = vld [vmem:[#allocation5 + $0x2c8] sm:$0xff]  }
 0x449   :  { %v6157_v5 = vmax.f32 %v869_v42, %v894_v2  ;;  %4530 = vmatpush3.bf16.msra.mxu1 %v4920_v24  ;;  %4509 = vmatprep.subr.bf16.mxu0 %v4921_v41  ;;  %v1210_v24 = vpack.c.bf16 %v1123_v34, %v1123_v34  ;;  %v4952_v41 = vld [vmem:[#allocation5 + $0x280] sm:$0xff]   ;;  %v4957_v2 = vld [vmem:[#allocation5 + $0x250] sm:$0xff]  }
 0x44a   :  { %2281 = vmatprep.mubr.bf16.mxu1 %v1208_v43  ;;  %4531 = vmatprep.subr.bf16.mxu1 %v4923_v60  ;;  %v4954_v60 = vld [vmem:[#allocation5 + $0x208] sm:$0xff]   ;;  %v4959_v43 = vld [vmem:[#allocation5 + $0x2d0] sm:$0xff]   ;;  %v4984_v34 = vld [vmem:[#allocation5 + $0x380] sm:$0xff]  }
 0x44b   :  { %v884_v44 = vpop.permute.xlu0 %883  ;;  %v888_v62 = vpop.permute.xlu1 %887  ;;  %4510 = vmatpush3.bf16.msra.mxu0 %v4922_v29  ;;  %907 = vrot.lane.b32.xlu0 %v6157_v5, %s5259_s29  ;;  %v4956_v29 = vld [vmem:[#allocation5 + $0x288] sm:$0xff]  }
 0x44c   :  { %v892_v16 = vsel %vm257_vm5, %v880_v51, %v884_v44  ;;  %v890_v42 = vsel %vm257_vm5, %v884_v44, %v888_v62  ;;  %4511 = vmatprep.subr.bf16.mxu0 %v4925_v35  ;;  %v896_v32 = vsel %vm257_vm5, %v888_v62, %v876_v58  ;;  %v1207_v58 = vpack.c.bf16 %v1000_v26, %v1000_v26  ;;  %v4958_v35 = vld [vmem:[#allocation5 + $0x210] sm:$0xff]   ;;  %v4963_v62 = vld [vmem:[#allocation5 + $0x2d8] sm:$0xff]  }
 0x44d   :  { %v6167_v28 = vmax.f32 %v870_v9, %v892_v16  ;;  %v6171_v53 = vmax.f32 %v871_v61, %v890_v42  ;;  %4532 = vmatpush3.bf16.msra.mxu1 %v4924_v49  ;;  %v6181_v9 = vmax.f32 %v872_v0, %v896_v32  ;;  %v4932_v61 = vld [vmem:[#allocation5 + $0x198] sm:$0xff]   ;;  %v4936_v0 = vld [vmem:[#allocation5 + $0x1a0] sm:$0xff]   ;;  %v1212_v51 = vpack.c.bf16 %v1133_v25, %v1133_v25  ;;  %v4960_v44 = vld [vmem:[#allocation5 + $0x290] sm:$0xff]  }
 0x44e   :  { %4533 = vmatprep.subr.bf16.mxu1 %v4927_v33  ;;  %v4961_v49 = vld [vmem:[#allocation5 + $0x258] sm:$0xff]   ;;  %v4965_v16 = vld [vmem:[#allocation5 + $0x260] sm:$0xff]   ;;  %v4988_v25 = vld [vmem:[#allocation5 + $0x388] sm:$0xff]  }
 0x44f   :  { %911 = vrot.lane.b32.xlu1 %v6167_v28, %s5259_s29  ;;  %4512 = vmatpush3.bf16.msra.mxu0 %v4926_v11  ;;  %v4962_v33 = vld [vmem:[#allocation5 + $0x218] sm:$0xff]   ;;  %v952_v11 = vcombine.high %v6128_v4, %v5265_v27  ;;  %v4966_v32 = vld [vmem:[#allocation5 + $0x220] sm:$0xff]  }
 0x450   :  { %915 = vrot.lane.b32.xlu0 %v6171_v53, %s5259_s29  ;;  %4513 = vmatprep.subr.bf16.mxu0 %v4929_v19  ;;  %v4964_v42 = vld [vmem:[#allocation5 + $0x298] sm:$0xff]   ;;  %v4967_v19 = vld [vmem:[#allocation5 + $0x2e0] sm:$0xff]  }
 0x451   :  { %4534 = vmatpush3.bf16.msra.mxu1 %v4928_v23  ;;  %v937_v23 = vcombine.high %v6120_v45, %v5265_v27 }
 0x452   :  { %4535 = vmatprep.subr.bf16.mxu1 %v4931_v54  ;;  %v4969_v54 = vld [vmem:[#allocation5 + $0x268] sm:$0xff]  }
 0x453   :  { %919 = vrot.lane.b32.xlu1 %v6181_v9, %s5259_s29  ;;  %4514 = vmatpush3.bf16.msra.mxu0 %v4930_v3  ;;  %v4968_v3 = vld [vmem:[#allocation5 + $0x2a0] sm:$0xff]   ;;  %v6211_v4 = vrot.slane %v937_v23, %v6118_v39  ;;  %v5011_v23 = vld [vmem:[#allocation5 + $0x3f8] sm:$0xff]  }
 0x454   :  { %4515 = vmatprep.subr.bf16.mxu0 %v4933_v20  ;;  %v6208_v20 = vrot.slane %v952_v11, %v6118_v39  ;;  %v5006_v11 = vld [vmem:[#allocation5 + $0x330] sm:$0xff]  }
 0x455   :  { %4536 = vmatpush3.bf16.msra.mxu1 %v4932_v61  ;;  %v4971_v61 = vld [vmem:[#allocation5 + $0x2e8] sm:$0xff]  }
 0x456   :  { %4537 = vmatprep.subr.bf16.mxu1 %v4935_v31  ;;  %v4970_v31 = vld [vmem:[#allocation5 + $0x228] sm:$0xff]   ;;  %v983_v45 = vcombine.low %v6211_v4, %v6208_v20 }
 0x457   :  { %4516 = vmatpush3.bf16.msra.mxu0 %v4934_v14  ;;  %v4972_v14 = vld [vmem:[#allocation5 + $0x2a8] sm:$0xff]  }
 0x458   :  { %4517 = vmatprep.subr.bf16.mxu0 %v4937_v63  ;;  %v4975_v63 = vld [vmem:[#allocation5 + $0x2f0] sm:$0xff]  }
 0x459   :  { %4538 = vmatpush3.bf16.msra.mxu1 %v4936_v0  ;;  %v1116_v0 = vcombine.high %v6193_v18, %v6190_v17  ;;  %v4983_v17 = vld [vmem:[#allocation5 + $0x3c0] sm:$0xff]  }
 0x45a   :  { %4539 = vmatprep.subr.bf16.mxu1 %v4939_v40  ;;  %v4977_v40 = vld [vmem:[#allocation5 + $0x278] sm:$0xff]   ;;  %v4982_v18 = vld [vmem:[#allocation5 + $0x300] sm:$0xff]  }
 0x45b   :  { %4518 = vmatpush3.bf16.msra.mxu0 %v4938_v13  ;;  %v4976_v13 = vld [vmem:[#allocation5 + $0x2b0] sm:$0xff]  }
 0x45c   :  { %4519 = vmatprep.subr.bf16.mxu0 %v4941_v10  ;;  %v4979_v10 = vld [vmem:[#allocation5 + $0x2f8] sm:$0xff]  }
 0x45d   :  { %4540 = vmatpush3.bf16.msra.mxu1 %v4940_v50  ;;  %v991_v50 = vrot.slane %v983_v45, %v6133_v52  ;;  %v5017_v45 = vld [vmem:[#allocation5 + $0x448] sm:$0xff]  }
 0x45e   :  { %4541 = vmatprep.subr.bf16.mxu1 %v4943_v46  ;;  %v1130_v46 = vrot.slane %v1116_v0, %v6133_v52  ;;  %v5019_v0 = vld [vmem:[#allocation5 + $0x4c8] sm:$0xff]  }
 0x45f   :  { %4520 = vmatpush3.bf16.msra.mxu0 %v4942_v30  ;;  %v4981_v30 = vld [vmem:[#allocation5 + $0x340] sm:$0xff]   ;;  %v1209_v37 = vpack.c.bf16 %v991_v50, %v991_v50 }
 0x460   :  { %4521 = vmatprep.subr.bf16.mxu0 %v4945_v22  ;;  %v1001_v22 = vcombine.high %v991_v50, %v5265_v27  ;;  %v5023_v50 = vld [vmem:[#allocation5 + $0x4d0] sm:$0xff]  }
 0x461   :  { %4542 = vmatpush3.bf16.msra.mxu1 %v4944_v21  ;;  %v1134_v21 = vcombine.high %v1130_v46, %v5265_v27 }
 0x462   :  { %4543 = vmatprep.subr.bf16.mxu1 %v4947_v55  ;;  %v4985_v55 = vld [vmem:[#allocation5 + $0x348] sm:$0xff]  }
 0x463   :  { %4522 = vmatpush3.bf16.msra.mxu0 %v4946_v59  ;;  %v1214_v59 = vpack.c.bf16 %v1130_v46, %v1130_v46  ;;  %v1216_v26 = vpack.c.bf16 %v1134_v21, %v1134_v21  ;;  %v5025_v46 = vld [vmem:[#allocation5 + $0x458] sm:$0xff]   ;;  %v5031_v21 = vld [vmem:[#allocation5 + $0x4e0] sm:$0xff]  }
 0x464   :  { %4551 = vmatprep.subr.bf16.mxu0 %v4949_v8  ;;  %v1211_v8 = vpack.c.bf16 %v1001_v22, %v1001_v22  ;;  %v5026_v22 = vld [vmem:[#allocation5 + $0x418] sm:$0xff]  }
 0x465   :  { %4544 = vmatpush3.bf16.msra.mxu1 %v4948_v15  ;;  %v4987_v15 = vld [vmem:[#allocation5 + $0x3c8] sm:$0xff]  }
 0x466   :  { %2146 = vmatmul.mubr.bf16.vlgmr.msra.gmra.mrb[8].mxu0 %v1205_v48  ;;  %4573 = vmatprep.subr.bf16.mxu1 %v4951_v38  ;;  %v4986_v38 = vld [vmem:[#allocation5 + $0x308] sm:$0xff]   ;;  %v4991_v48 = vld [vmem:[#allocation5 + $0x3d0] sm:$0xff]  }
 0x467   :  { %4552 = vmatpush3.bf16.msra.mxu0 %v4950_v57  ;;  %2417 = vmatprep.mubr.bf16.mxu0 %v1210_v24  ;;  %v4989_v57 = vld [vmem:[#allocation5 + $0x350] sm:$0xff]   ;;  %v4993_v24 = vld [vmem:[#allocation5 + $0x358] sm:$0xff]  }
 0x468   :  { %2282 = vmatmul.mubr.bf16.vlgmr.msra.gmra.mrb[16].mxu1 %v1207_v58  ;;  %4553 = vmatprep.subr.bf16.mxu0 %v4953_v12  ;;  %v4990_v12 = vld [vmem:[#allocation5 + $0x310] sm:$0xff]   ;;  %v4995_v58 = vld [vmem:[#allocation5 + $0x3d8] sm:$0xff]  }
 0x469   :  { %4574 = vmatpush3.bf16.msra.mxu1 %v4952_v41  ;;  %2553 = vmatprep.mubr.bf16.mxu1 %v1212_v51  ;;  %v4992_v41 = vld [vmem:[#allocation5 + $0x390] sm:$0xff]   ;;  %v4997_v51 = vld [vmem:[#allocation5 + $0x360] sm:$0xff]  }
 0x46a   :  { %4575 = vmatprep.subr.bf16.mxu1 %v4955_v7  ;;  %v4994_v7 = vld [vmem:[#allocation5 + $0x318] sm:$0xff]  }
 0x46b   :  { %4554 = vmatpush3.bf16.msra.mxu0 %v4954_v60  ;;  %v4996_v60 = vld [vmem:[#allocation5 + $0x398] sm:$0xff]  }
 0x46c   :  { %4555 = vmatprep.subr.bf16.mxu0 %v4957_v2  ;;  %v4999_v2 = vld [vmem:[#allocation5 + $0x3e0] sm:$0xff]  }
 0x46d   :  { %4576 = vmatpush3.bf16.msra.mxu1 %v4956_v29  ;;  %v4998_v29 = vld [vmem:[#allocation5 + $0x320] sm:$0xff]  }
 0x46e   :  { %4577 = vmatprep.subr.bf16.mxu1 %v4959_v43  ;;  %v5001_v43 = vld [vmem:[#allocation5 + $0x368] sm:$0xff]  }
 0x46f   :  { %4556 = vmatpush3.bf16.msra.mxu0 %v4958_v35  ;;  %v5000_v35 = vld [vmem:[#allocation5 + $0x3a0] sm:$0xff]  }
 0x470   :  { %4557 = vmatprep.subr.bf16.mxu0 %v4961_v49  ;;  %v5003_v49 = vld [vmem:[#allocation5 + $0x3e8] sm:$0xff]  }
 0x471   :  { %4578 = vmatpush3.bf16.msra.mxu1 %v4960_v44  ;;  %v5002_v44 = vld [vmem:[#allocation5 + $0x328] sm:$0xff]  }
 0x472   :  { %4579 = vmatprep.subr.bf16.mxu1 %v4963_v62  ;;  %v5005_v62 = vld [vmem:[#allocation5 + $0x370] sm:$0xff]  }
 0x473   :  { %4558 = vmatpush3.bf16.msra.mxu0 %v4962_v33  ;;  %v5004_v33 = vld [vmem:[#allocation5 + $0x3a8] sm:$0xff]  }
 0x474   :  { %4559 = vmatprep.subr.bf16.mxu0 %v4965_v16  ;;  %v984_v16 = vcombine.high %v6211_v4, %v6208_v20  ;;  %v5015_v4 = vld [vmem:[#allocation5 + $0x4c0] sm:$0xff]  }
 0x475   :  { %4580 = vmatpush3.bf16.msra.mxu1 %v4964_v42  ;;  %v5007_v42 = vld [vmem:[#allocation5 + $0x3f0] sm:$0xff]  }
 0x476   :  { %4581 = vmatprep.subr.bf16.mxu1 %v4967_v19  ;;  %v5009_v19 = vld [vmem:[#allocation5 + $0x378] sm:$0xff]  }
 0x477   :  { %4560 = vmatpush3.bf16.msra.mxu0 %v4966_v32  ;;  %v5008_v32 = vld [vmem:[#allocation5 + $0x3b0] sm:$0xff]  }
 0x478   :  { %4561 = vmatprep.subr.bf16.mxu0 %v4969_v54  ;;  %v998_v54 = vrot.slane %v984_v16, %v6133_v52 }
 0x479   :  { %4582 = vmatpush3.bf16.msra.mxu1 %v4968_v3  ;;  %v5010_v3 = vld [vmem:[#allocation5 + $0x338] sm:$0xff]  }
 0x47a   :  { %4583 = vmatprep.subr.bf16.mxu1 %v4971_v61  ;;  %v5013_v61 = vld [vmem:[#allocation5 + $0x440] sm:$0xff]   ;;  %v1002_v20 = vcombine.high %v998_v54, %v5265_v27 }
 0x47b   :  { %4562 = vmatpush3.bf16.msra.mxu0 %v4970_v31  ;;  %v5012_v31 = vld [vmem:[#allocation5 + $0x3b8] sm:$0xff]  }
 0x47c   :  { %4563 = vmatprep.subr.bf16.mxu0 %v4973_v1  ;;  %v5014_v1 = vld [vmem:[#allocation5 + $0x400] sm:$0xff]  }
 0x47d   :  { %4584 = vmatpush3.bf16.msra.mxu1 %v4972_v14  ;;  %v1213_v14 = vpack.c.bf16 %v998_v54, %v998_v54 }
 0x47e   :  { %4585 = vmatprep.subr.bf16.mxu1 %v4975_v63  ;;  %v5016_v63 = vld [vmem:[#allocation5 + $0x480] sm:$0xff]  }
 0x47f   :  { %4564 = vmatpush3.bf16.msra.mxu0 %v4974_v47  ;;  %v1215_v47 = vpack.c.bf16 %v1002_v20, %v1002_v20  ;;  %v5046_v20 = vld [vmem:[#allocation5 + $0x500] sm:$0xff]  }
 0x480   :  { %4565 = vmatprep.subr.bf16.mxu0 %v4977_v40  ;;  %v5018_v40 = vld [vmem:[#allocation5 + $0x408] sm:$0xff]  }
 0x481   :  { %4586 = vmatpush3.bf16.msra.mxu1 %v4976_v13  ;;  %v5021_v13 = vld [vmem:[#allocation5 + $0x450] sm:$0xff]  }
 0x482   :  { %4587 = vmatprep.subr.bf16.mxu1 %v4979_v10  ;;  %v5020_v10 = vld [vmem:[#allocation5 + $0x488] sm:$0xff]  }
 0x483   :  { %4566 = vmatpush3.bf16.msra.mxu0 %v4978_v56  ;;  %v5022_v56 = vld [vmem:[#allocation5 + $0x410] sm:$0xff]  }
 0x484   :  { %4595 = vmatprep.subr.bf16.mxu0 %v4981_v30  ;;  %v5024_v30 = vld [vmem:[#allocation5 + $0x490] sm:$0xff]  }
 0x485   :  { %4588 = vmatpush3.bf16.msra.mxu1 %v4980_v36  ;;  %v5027_v36 = vld [vmem:[#allocation5 + $0x4d8] sm:$0xff]  }
 0x486   :  { %2418 = vmatmul.mubr.bf16.vlgmr.msra.gmra.mrb[12].mxu0 %v1209_v37  ;;  %4617 = vmatprep.subr.bf16.mxu1 %v4983_v17  ;;  %v5029_v17 = vld [vmem:[#allocation5 + $0x460] sm:$0xff]  }
 0x487   :  { %4596 = vmatpush3.bf16.msra.mxu0 %v4982_v18  ;;  %2689 = vmatprep.mubr.bf16.mxu0 %v1214_v59  ;;  %v5028_v18 = vld [vmem:[#allocation5 + $0x498] sm:$0xff]   ;;  %v5030_v37 = vld [vmem:[#allocation5 + $0x420] sm:$0xff]  }
 0x488   :  { %2554 = vmatmul.mubr.bf16.vlgmr.msra.gmra.mrb[20].mxu1 %v1211_v8  ;;  %4597 = vmatprep.subr.bf16.mxu0 %v4985_v55  ;;  %v5033_v55 = vld [vmem:[#allocation5 + $0x468] sm:$0xff]   ;;  %v5032_v59 = vld [vmem:[#allocation5 + $0x4a0] sm:$0xff]  }
 0x489   :  { %4618 = vmatpush3.bf16.msra.mxu1 %v4984_v34  ;;  %2825 = vmatprep.mubr.bf16.mxu1 %v1216_v26  ;;  %v5035_v34 = vld [vmem:[#allocation5 + $0x4e8] sm:$0xff]  }
 0x48a   :  { %4619 = vmatprep.subr.bf16.mxu1 %v4987_v15  ;;  %v5034_v8 = vld [vmem:[#allocation5 + $0x428] sm:$0xff]   ;;  %v5037_v15 = vld [vmem:[#allocation5 + $0x470] sm:$0xff]  }
 0x48b   :  { %4598 = vmatpush3.bf16.msra.mxu0 %v4986_v38  ;;  %v5036_v26 = vld [vmem:[#allocation5 + $0x4a8] sm:$0xff]   ;;  %v5039_v38 = vld [vmem:[#allocation5 + $0x4f0] sm:$0xff]  }
 0x48c   :  { %4599 = vmatprep.subr.bf16.mxu0 %v4989_v57  ;;  %v5038_v57 = vld [vmem:[#allocation5 + $0x430] sm:$0xff]  }
 0x48d   :  { %4620 = vmatpush3.bf16.msra.mxu1 %v4988_v25  ;;  %v5041_v25 = vld [vmem:[#allocation5 + $0x478] sm:$0xff]  }
 0x48e   :  { %4621 = vmatprep.subr.bf16.mxu1 %v4991_v48 }
 0x48f   :  { %4600 = vmatpush3.bf16.msra.mxu0 %v4990_v12  ;;  %v5040_v12 = vld [vmem:[#allocation5 + $0x4b0] sm:$0xff]  }
 0x490   :  { %4601 = vmatprep.subr.bf16.mxu0 %v4993_v24  ;;  %v5043_v24 = vld [vmem:[#allocation5 + $0x4f8] sm:$0xff]  }
 0x491   :  { %4622 = vmatpush3.bf16.msra.mxu1 %v4992_v41  ;;  %v5042_v41 = vld [vmem:[#allocation5 + $0x438] sm:$0xff]  }
 0x492   :  { %4623 = vmatprep.subr.bf16.mxu1 %v4995_v58 }
 0x493   :  { %4602 = vmatpush3.bf16.msra.mxu0 %v4994_v7  ;;  %v5045_v7 = vld [vmem:[#allocation5 + $0x540] sm:$0xff]  }
 0x494   :  { %4603 = vmatprep.subr.bf16.mxu0 %v4997_v51 }
 0x495   :  { %4624 = vmatpush3.bf16.msra.mxu1 %v4996_v60 }
 0x496   :  { %4625 = vmatprep.subr.bf16.mxu1 %v4999_v2  ;;  %v5044_v2 = vld [vmem:[#allocation5 + $0x4b8] sm:$0xff]  }
 0x497   :  { %4604 = vmatpush3.bf16.msra.mxu0 %v4998_v29 }
 0x498   :  { %4605 = vmatprep.subr.bf16.mxu0 %v5001_v43  ;;  %v5047_v43 = vld [vmem:[#allocation5 + $0x5c0] sm:$0xff]  }
 0x499   :  { %4626 = vmatpush3.bf16.msra.mxu1 %v5000_v35 }
 0x49a   :  { %4627 = vmatprep.subr.bf16.mxu1 %v5003_v49 }
 0x49b   :  { %4606 = vmatpush3.bf16.msra.mxu0 %v5002_v44 }
 0x49c   :  { %4607 = vmatprep.subr.bf16.mxu0 %v5005_v62 }
 0x49d   :  { %4628 = vmatpush3.bf16.msra.mxu1 %v5004_v33 }
 0x49e   :  { %4629 = vmatprep.subr.bf16.mxu1 %v5007_v42 }
 0x49f   :  { %4608 = vmatpush3.bf16.msra.mxu0 %v5006_v11 }
 0x4a0   :  { %4609 = vmatprep.subr.bf16.mxu0 %v5009_v19 }
 0x4a1   :  { %4630 = vmatpush3.bf16.msra.mxu1 %v5008_v32 }
 0x4a2   :  { %4631 = vmatprep.subr.bf16.mxu1 %v5011_v23 }
 0x4a3   :  { %4610 = vmatpush3.bf16.msra.mxu0 %v5010_v3 }
 0x4a4   :  { %4639 = vmatprep.subr.bf16.mxu0 %v5013_v61 }
 0x4a5   :  { %4632 = vmatpush3.bf16.msra.mxu1 %v5012_v31 }
 0x4a6   :  { %2690 = vmatmul.mubr.bf16.vlgmr.msra.gmra.mrb[16].mxu0 %v1213_v14  ;;  %4661 = vmatprep.subr.bf16.mxu1 %v5015_v4 }
 0x4a7   :  { %4640 = vmatpush3.bf16.msra.mxu0 %v5014_v1 }
 0x4a8   :  { %2826 = vmatmul.mubr.bf16.vlgmr.msra.gmra.mrb[24].mxu1 %v1215_v47  ;;  %4641 = vmatprep.subr.bf16.mxu0 %v5017_v45  ;;  %v5049_v47 = vld [vmem:[#allocation5 + $0x548] sm:$0xff]  }
 0x4a9   :  { %4662 = vmatpush3.bf16.msra.mxu1 %v5016_v63  ;;  %v5048_v63 = vld [vmem:[#allocation5 + $0x580] sm:$0xff]  }
 0x4aa   :  { %4663 = vmatprep.subr.bf16.mxu1 %v5019_v0 }
 0x4ab   :  { %4642 = vmatpush3.bf16.msra.mxu0 %v5018_v40  ;;  %v5051_v40 = vld [vmem:[#allocation5 + $0x5c8] sm:$0xff]  }
 0x4ac   :  { %4643 = vmatprep.subr.bf16.mxu0 %v5021_v13  ;;  %v5050_v13 = vld [vmem:[#allocation5 + $0x508] sm:$0xff]  }
 0x4ad   :  { %4664 = vmatpush3.bf16.msra.mxu1 %v5020_v10 }
 0x4ae   :  { %4665 = vmatprep.subr.bf16.mxu1 %v5023_v50  ;;  %v5053_v50 = vld [vmem:[#allocation5 + $0x550] sm:$0xff]  }
 0x4af   :  { %4644 = vmatpush3.bf16.msra.mxu0 %v5022_v56  ;;  %v5052_v56 = vld [vmem:[#allocation5 + $0x588] sm:$0xff]  }
 0x4b0   :  { %4645 = vmatprep.subr.bf16.mxu0 %v5025_v46  ;;  %v5055_v46 = vld [vmem:[#allocation5 + $0x5d0] sm:$0xff]  }
 0x4b1   :  { %4666 = vmatpush3.bf16.msra.mxu1 %v5024_v30  ;;  %v5054_v30 = vld [vmem:[#allocation5 + $0x510] sm:$0xff]  }
 0x4b2   :  { %4667 = vmatprep.subr.bf16.mxu1 %v5027_v36  ;;  %v5057_v36 = vld [vmem:[#allocation5 + $0x558] sm:$0xff]  }
 0x4b3   :  { %4646 = vmatpush3.bf16.msra.mxu0 %v5026_v22  ;;  %v5056_v22 = vld [vmem:[#allocation5 + $0x590] sm:$0xff]  }
 0x4b4   :  { %4647 = vmatprep.subr.bf16.mxu0 %v5029_v17  ;;  %v5059_v17 = vld [vmem:[#allocation5 + $0x5d8] sm:$0xff]  }
 0x4b5   :  { %4668 = vmatpush3.bf16.msra.mxu1 %v5028_v18  ;;  %v5058_v18 = vld [vmem:[#allocation5 + $0x518] sm:$0xff]  }
 0x4b6   :  { %4669 = vmatprep.subr.bf16.mxu1 %v5031_v21  ;;  %v5061_v21 = vld [vmem:[#allocation5 + $0x560] sm:$0xff]  }
 0x4b7   :  { %4648 = vmatpush3.bf16.msra.mxu0 %v5030_v37  ;;  %v5060_v37 = vld [vmem:[#allocation5 + $0x598] sm:$0xff]  }
 0x4b8   :  { %4649 = vmatprep.subr.bf16.mxu0 %v5033_v55  ;;  %v5063_v55 = vld [vmem:[#allocation5 + $0x5e0] sm:$0xff]  }
 0x4b9   :  { %4670 = vmatpush3.bf16.msra.mxu1 %v5032_v59 }
 0x4ba   :  { %4671 = vmatprep.subr.bf16.mxu1 %v5035_v34  ;;  %v5062_v34 = vld [vmem:[#allocation5 + $0x520] sm:$0xff]  }
 0x4bb   :  { %4650 = vmatpush3.bf16.msra.mxu0 %v5034_v8  ;;  %v5065_v8 = vld [vmem:[#allocation5 + $0x568] sm:$0xff]  }
 0x4bc   :  { %4651 = vmatprep.subr.bf16.mxu0 %v5037_v15 }
 0x4bd   :  { %v908_v48 = vpop.permute.xlu0 %907  ;;  %4672 = vmatpush3.bf16.msra.mxu1 %v5036_v26  ;;  %v5064_v26 = vld [vmem:[#allocation5 + $0x5a0] sm:$0xff]  }
 0x4be   :  { %4673 = vmatprep.subr.bf16.mxu1 %v5039_v38  ;;  %v5067_v38 = vld [vmem:[#allocation5 + $0x5e8] sm:$0xff]  }
 0x4bf   :  { %4652 = vmatpush3.bf16.msra.mxu0 %v5038_v57 }
 0x4c0   :  { %4653 = vmatprep.subr.bf16.mxu0 %v5041_v25  ;;  %v5066_v25 = vld [vmem:[#allocation5 + $0x528] sm:$0xff]  }
 0x4c1   :  { %v912_v58 = vpop.permute.xlu1 %911  ;;  %4674 = vmatpush3.bf16.msra.mxu1 %v5040_v12 }
 0x4c2   :  { %v916_v51 = vpop.permute.xlu0 %915  ;;  %v926_v60 = vsel %vm337_vm6, %v908_v48, %v912_v58  ;;  %4675 = vmatprep.subr.bf16.mxu1 %v5043_v24  ;;  %v5068_v24 = vld [vmem:[#allocation5 + $0x5a8] sm:$0xff]  }
 0x4c3   :  { %v924_v29 = vsel %vm337_vm6, %v912_v58, %v916_v51  ;;  %4654 = vmatpush3.bf16.msra.mxu0 %v5042_v41  ;;  %v6230_v35 = vmax.f32 %v6157_v5, %v926_v60  ;;  %v5071_v58 = vld [vmem:[#allocation5 + $0x5f0] sm:$0xff]   ;;  %v5073_v60 = vld [vmem:[#allocation5 + $0x578] sm:$0xff]  }
 0x4c4   :  { %4683 = vmatprep.subr.bf16.mxu0 %v5045_v7  ;;  %v6233_v44 = vmax.f32 %v6167_v28, %v924_v29  ;;  %v5070_v7 = vld [vmem:[#allocation5 + $0x530] sm:$0xff]  }
 0x4c5   :  { %v920_v49 = vpop.permute.xlu1 %919  ;;  %4676 = vmatpush3.bf16.msra.mxu1 %v5044_v2  ;;  %v6245_v5 = vrot.slane %v6230_v35, %v6118_v39  ;;  %v5072_v2 = vld [vmem:[#allocation5 + $0x5b0] sm:$0xff]  }
 0x4c6   :  { %v922_v62 = vsel %vm337_vm6, %v916_v51, %v920_v49  ;;  %v928_v33 = vsel %vm337_vm6, %v920_v49, %v908_v48  ;;  %4705 = vmatprep.subr.bf16.mxu1 %v5047_v43  ;;  %v1142_v6 = vrot.slane %v6233_v44, %v6118_v39  ;;  %v1135_v15 = vcombine.high %v6233_v44, %v5265_v27  ;;  %v5069_v48 = vld [vmem:[#allocation5 + $0x570] sm:$0xff]   ;;  %v5075_v43 = vld [vmem:[#allocation5 + $0x5f8] sm:$0xff]  }
 0x4c7   :  { %v6240_v16 = vmax.f32 %v6171_v53, %v922_v62  ;;  %v936_v42 = vmax.f32 %v6181_v9, %v928_v33  ;;  %v5074_v49 = vld [vmem:[#allocation5 + $0x538] sm:$0xff]   ;;  %v5077_v62 = vld [vmem:[#allocation5 + $0x640] sm:$0xff]  }
 0x4c8   :  { %v6269_v12 = vrot.slane %v1135_v15, %v6118_v39  ;;  %v5076_v33 = vld [vmem:[#allocation5 + $0x5b8] sm:$0xff]  }
 0x4c9   :  { %v6249_v28 = vrot.slane %v6240_v16, %v6118_v39  ;;  %v1157_v11 = vrot.slane %v936_v42, %v6118_v39  ;;  %v1150_v59 = vcombine.high %v936_v42, %v5265_v27  ;;  %v5106_v15 = vld [vmem:[#allocation5 + $0x638] sm:$0xff]  }
 0x4cb   :  { %v1033_v53 = vcombine.low %v6245_v5, %v6249_v28  ;;  %v1165_v19 = vcombine.low %v1142_v6, %v1157_v11  ;;  %v1166_v32 = vcombine.high %v1142_v6, %v1157_v11  ;;  %v6266_v57 = vrot.slane %v1150_v59, %v6118_v39  ;;  %v5105_v59 = vld [vmem:[#allocation5 + $0x678] sm:$0xff]  }
 0x4cc   :  { %v1034_v41 = vcombine.high %v6245_v5, %v6249_v28  ;;  %v5079_v5 = vld [vmem:[#allocation5 + $0x6c0] sm:$0xff]  }
 0x4cd   :  { %v1041_v9 = vrot.slane %v1033_v53, %v6133_v52  ;;  %v1173_v23 = vrot.slane %v1165_v19, %v6133_v52  ;;  %v1180_v54 = vrot.slane %v1166_v32, %v6133_v52  ;;  %v1181_v51 = vcombine.low %v6269_v12, %v6266_v57  ;;  %v5078_v28 = vld [vmem:[#allocation5 + $0x600] sm:$0xff]   ;;  %v5081_v53 = vld [vmem:[#allocation5 + $0x648] sm:$0xff]  }
 0x4ce   :  { %v1048_v29 = vrot.slane %v1034_v41, %v6133_v52  ;;  %v5080_v32 = vld [vmem:[#allocation5 + $0x680] sm:$0xff]  }
 0x4cf   :  { %v1217_v3 = vpack.c.bf16 %v1041_v9, %v1041_v9  ;;  %v1065_v61 = vcombine.high %v1041_v9, %v5265_v27  ;;  %v1218_v31 = vpack.c.bf16 %v1173_v23, %v1173_v23  ;;  %v1197_v4 = vcombine.high %v1173_v23, %v5265_v27  ;;  %v5083_v23 = vld [vmem:[#allocation5 + $0x6c8] sm:$0xff]  }
 0x4d0   :  { %v1198_v14 = vcombine.high %v1180_v54, %v5265_v27  ;;  %v1222_v0 = vpack.c.bf16 %v1180_v54, %v1180_v54  ;;  %v1189_v44 = vrot.slane %v1181_v51, %v6133_v52  ;;  %v1066_v42 = vcombine.high %v1048_v29, %v5265_v27  ;;  %v5112_v51 = vld [vmem:[#allocation5 + $0x780] sm:$0xff]  }
 0x4d1   :  { %v1219_v1 = vpack.c.bf16 %v1065_v61, %v1065_v61  ;;  %2961 = vmatprep.mubr.bf16.mxu0 %v1218_v31  ;;  %v1220_v45 = vpack.c.bf16 %v1197_v4, %v1197_v4  ;;  %v1221_v6 = vpack.c.bf16 %v1048_v29, %v1048_v29  ;;  %v5085_v61 = vld [vmem:[#allocation5 + $0x650] sm:$0xff]   ;;  %v5084_v31 = vld [vmem:[#allocation5 + $0x688] sm:$0xff]  }
 0x4d2   :  { %2962 = vmatmul.mubr.bf16.vlgmr.msra.gmra.mrb[20].mxu0 %v1217_v3  ;;  %v1224_v10 = vpack.c.bf16 %v1198_v14, %v1198_v14  ;;  %v1199_v11 = vcombine.high %v1189_v44, %v5265_v27  ;;  %v1226_v19 = vpack.c.bf16 %v1189_v44, %v1189_v44  ;;  %v1223_v9 = vpack.c.bf16 %v1066_v42, %v1066_v42  ;;  %v5082_v3 = vld [vmem:[#allocation5 + $0x608] sm:$0xff]   ;;  %v5086_v4 = vld [vmem:[#allocation5 + $0x610] sm:$0xff]   ;;  %v5121_v42 = vld [vmem:[#allocation5 + $0x758] sm:$0xff]  }
 0x4d3   :  { %4684 = vmatpush3.bf16.msra.mxu0 %v5046_v20  ;;  %3097 = vmatprep.mubr.bf16.mxu1 %v1220_v45  ;;  %v5087_v20 = vld [vmem:[#allocation5 + $0x6d0] sm:$0xff]   ;;  %v5091_v45 = vld [vmem:[#allocation5 + $0x6d8] sm:$0xff]   ;;  %v5116_v44 = vld [vmem:[#allocation5 + $0x788] sm:$0xff]  }
 0x4d4   :  { %3233 = vmatprep.mubr.bf16.mxu0 %v1222_v0  ;;  %3098 = vmatmul.mubr.bf16.vlgmr.msra.gmra.mrb[28].mxu1 %v1219_v1  ;;  %v1228_v54 = vpack.c.bf16 %v1199_v11, %v1199_v11  ;;  %v5089_v1 = vld [vmem:[#allocation5 + $0x658] sm:$0xff]   ;;  %v5088_v14 = vld [vmem:[#allocation5 + $0x690] sm:$0xff]  }
 0x4d5   :  { %4706 = vmatpush3.bf16.msra.mxu1 %v5048_v63  ;;  %4685 = vmatprep.subr.bf16.mxu0 %v5049_v47  ;;  %v5090_v63 = vld [vmem:[#allocation5 + $0x618] sm:$0xff]   ;;  %v5093_v47 = vld [vmem:[#allocation5 + $0x660] sm:$0xff]  }
 0x4d6   :  { %3369 = vmatprep.mubr.bf16.mxu1 %v1224_v10  ;;  %4707 = vmatprep.subr.bf16.mxu1 %v5051_v40  ;;  %v5092_v0 = vld [vmem:[#allocation5 + $0x698] sm:$0xff]   ;;  %v1018_v40 = vcombine.high %v6240_v16, %v5265_v27  ;;  %v5094_v10 = vld [vmem:[#allocation5 + $0x620] sm:$0xff]  }
 0x4d7   :  { %4686 = vmatpush3.bf16.msra.mxu0 %v5050_v13  ;;  %v5095_v13 = vld [vmem:[#allocation5 + $0x6e0] sm:$0xff]  }
 0x4d8   :  { %4687 = vmatprep.subr.bf16.mxu0 %v5053_v50  ;;  %v1003_v50 = vcombine.high %v6230_v35, %v5265_v27 }
 0x4d9   :  { %4708 = vmatpush3.bf16.msra.mxu1 %v5052_v56  ;;  %v5097_v56 = vld [vmem:[#allocation5 + $0x668] sm:$0xff]  }
 0x4da   :  { %4709 = vmatprep.subr.bf16.mxu1 %v5055_v46  ;;  %v5096_v46 = vld [vmem:[#allocation5 + $0x6a0] sm:$0xff]   ;;  %v6287_v16 = vrot.slane %v1003_v50, %v6118_v39  ;;  %v5133_v50 = vld [vmem:[#allocation5 + $0x770] sm:$0xff]  }
 0x4db   :  { %4688 = vmatpush3.bf16.msra.mxu0 %v5054_v30  ;;  %v6284_v30 = vrot.slane %v1018_v40, %v6118_v39  ;;  %v5107_v39 = vld [vmem:[#allocation5 + $0x6f8] sm:$0xff]   ;;  %v5128_v40 = vld [vmem:[#allocation5 + $0x7a0] sm:$0xff]  }
 0x4dc   :  { %4689 = vmatprep.subr.bf16.mxu0 %v5057_v36  ;;  %v5099_v36 = vld [vmem:[#allocation5 + $0x6e8] sm:$0xff]  }
 0x4dd   :  { %4710 = vmatpush3.bf16.msra.mxu1 %v5056_v22  ;;  %v5098_v22 = vld [vmem:[#allocation5 + $0x628] sm:$0xff]   ;;  %v1049_v35 = vcombine.low %v6287_v16, %v6284_v30 }
 0x4de   :  { %4711 = vmatprep.subr.bf16.mxu1 %v5059_v17  ;;  %v5101_v17 = vld [vmem:[#allocation5 + $0x670] sm:$0xff]  }
 0x4df   :  { %4690 = vmatpush3.bf16.msra.mxu0 %v5058_v18  ;;  %v5100_v18 = vld [vmem:[#allocation5 + $0x6a8] sm:$0xff]  }
 0x4e0   :  { %4691 = vmatprep.subr.bf16.mxu0 %v5061_v21  ;;  %v5103_v21 = vld [vmem:[#allocation5 + $0x6f0] sm:$0xff]  }
 0x4e1   :  { %4712 = vmatpush3.bf16.msra.mxu1 %v5060_v37  ;;  %v5102_v37 = vld [vmem:[#allocation5 + $0x630] sm:$0xff]  }
 0x4e2   :  { %4713 = vmatprep.subr.bf16.mxu1 %v5063_v55  ;;  %v1182_v55 = vcombine.high %v6269_v12, %v6266_v57  ;;  %v5111_v57 = vld [vmem:[#allocation5 + $0x7c0] sm:$0xff]  }
 0x4e3   :  { %4692 = vmatpush3.bf16.msra.mxu0 %v5062_v34  ;;  %v5104_v34 = vld [vmem:[#allocation5 + $0x6b0] sm:$0xff]   ;;  %v5110_v12 = vld [vmem:[#allocation5 + $0x700] sm:$0xff]  }
 0x4e4   :  { %4693 = vmatprep.subr.bf16.mxu0 %v5065_v8  ;;  %v1057_v8 = vrot.slane %v1049_v35, %v6133_v52  ;;  %v5139_v35 = vld [vmem:[#allocation5 + $0x7f8] sm:$0xff]  }
 0x4e5   :  { %4714 = vmatpush3.bf16.msra.mxu1 %v5064_v26  ;;  %v1196_v26 = vrot.slane %v1182_v55, %v6133_v52  ;;  %v5140_v55 = vld [vmem:[#allocation5 + $0x7b8] sm:$0xff]  }
 0x4e6   :  { %4715 = vmatprep.subr.bf16.mxu1 %v5067_v38  ;;  %v5109_v38 = vld [vmem:[#allocation5 + $0x740] sm:$0xff]   ;;  %v1225_v41 = vpack.c.bf16 %v1057_v8, %v1057_v8 }
 0x4e7   :  { %4694 = vmatpush3.bf16.msra.mxu0 %v5066_v25  ;;  %v5108_v25 = vld [vmem:[#allocation5 + $0x6b8] sm:$0xff]  }
 0x4e8   :  { %4695 = vmatprep.subr.bf16.mxu0 %v5069_v48  ;;  %v1067_v48 = vcombine.high %v1057_v8, %v5265_v27 }
 0x4e9   :  { %4716 = vmatpush3.bf16.msra.mxu1 %v5068_v24  ;;  %v1200_v24 = vcombine.high %v1196_v26, %v5265_v27 }
 0x4ea   :  { %4717 = vmatprep.subr.bf16.mxu1 %v5071_v58  ;;  %v5113_v58 = vld [vmem:[#allocation5 + $0x748] sm:$0xff]  }
 0x4eb   :  { %4696 = vmatpush3.bf16.msra.mxu0 %v5070_v7  ;;  %v1230_v7 = vpack.c.bf16 %v1196_v26, %v1196_v26  ;;  %v1232_v29 = vpack.c.bf16 %v1200_v24, %v1200_v24 }
 0x4ec   :  { %4697 = vmatprep.subr.bf16.mxu0 %v5073_v60  ;;  %v1227_v60 = vpack.c.bf16 %v1067_v48, %v1067_v48 }
 0x4ed   :  { %4718 = vmatpush3.bf16.msra.mxu1 %v5072_v2  ;;  %v5115_v2 = vld [vmem:[#allocation5 + $0x7c8] sm:$0xff]  }
 0x4ee   :  { %4719 = vmatprep.subr.bf16.mxu1 %v5075_v43  ;;  %v5114_v43 = vld [vmem:[#allocation5 + $0x708] sm:$0xff]  }
 0x4ef   :  { %4698 = vmatpush3.bf16.msra.mxu0 %v5074_v49  ;;  %v5117_v49 = vld [vmem:[#allocation5 + $0x750] sm:$0xff]  }
 0x4f0   :  { %4727 = vmatprep.subr.bf16.mxu0 %v5077_v62  ;;  %v5119_v62 = vld [vmem:[#allocation5 + $0x7d0] sm:$0xff]  }
 0x4f1   :  { %4720 = vmatpush3.bf16.msra.mxu1 %v5076_v33  ;;  %v5118_v33 = vld [vmem:[#allocation5 + $0x710] sm:$0xff]  }
 0x4f2   :  { %3234 = vmatmul.mubr.bf16.vlgmr.msra.gmra.mrb[24].mxu0 %v1221_v6  ;;  %4749 = vmatprep.subr.bf16.mxu1 %v5079_v5  ;;  %v5123_v6 = vld [vmem:[#allocation5 + $0x7d8] sm:$0xff]  }
 0x4f3   :  { %4728 = vmatpush3.bf16.msra.mxu0 %v5078_v28  ;;  %3505 = vmatprep.mubr.bf16.mxu0 %v1226_v19  ;;  %v5120_v28 = vld [vmem:[#allocation5 + $0x790] sm:$0xff]  }
 0x4f4   :  { %3370 = vmatmul.mubr.bf16.vlgmr.msra.gmra.mrb[32].mxu1 %v1223_v9  ;;  %4729 = vmatprep.subr.bf16.mxu0 %v5081_v53  ;;  %v5122_v9 = vld [vmem:[#allocation5 + $0x718] sm:$0xff]  }
 0x4f5   :  { %4750 = vmatpush3.bf16.msra.mxu1 %v5080_v32  ;;  %3641 = vmatprep.mubr.bf16.mxu1 %v1228_v54 }
 0x4f6   :  { %4751 = vmatprep.subr.bf16.mxu1 %v5083_v23 }
 0x4f7   :  { %4730 = vmatpush3.bf16.msra.mxu0 %v5082_v3  ;;  %v5125_v3 = vld [vmem:[#allocation5 + $0x760] sm:$0xff]  }
 0x4f8   :  { %4731 = vmatprep.subr.bf16.mxu0 %v5085_v61 }
 0x4f9   :  { %4752 = vmatpush3.bf16.msra.mxu1 %v5084_v31 }
 0x4fa   :  { %4753 = vmatprep.subr.bf16.mxu1 %v5087_v20  ;;  %v5124_v20 = vld [vmem:[#allocation5 + $0x798] sm:$0xff]  }
 0x4fb   :  { %4732 = vmatpush3.bf16.msra.mxu0 %v5086_v4 }
 0x4fc   :  { %4733 = vmatprep.subr.bf16.mxu0 %v5089_v1  ;;  %v5127_v1 = vld [vmem:[#allocation5 + $0x7e0] sm:$0xff]  }
 0x4fd   :  { %4754 = vmatpush3.bf16.msra.mxu1 %v5088_v14 }
 0x4fe   :  { %4755 = vmatprep.subr.bf16.mxu1 %v5091_v45 }
 0x4ff   :  { %4734 = vmatpush3.bf16.msra.mxu0 %v5090_v63  ;;  %v5126_v63 = vld [vmem:[#allocation5 + $0x720] sm:$0xff]  }
 0x500   :  { %4735 = vmatprep.subr.bf16.mxu0 %v5093_v47 }
 0x501   :  { %4756 = vmatpush3.bf16.msra.mxu1 %v5092_v0  ;;  %v5129_v0 = vld [vmem:[#allocation5 + $0x768] sm:$0xff]  }
 0x502   :  { %4757 = vmatprep.subr.bf16.mxu1 %v5095_v13  ;;  %v5131_v13 = vld [vmem:[#allocation5 + $0x7e8] sm:$0xff]  }
 0x503   :  { %4736 = vmatpush3.bf16.msra.mxu0 %v5094_v10  ;;  %v5130_v10 = vld [vmem:[#allocation5 + $0x728] sm:$0xff]  }
 0x504   :  { %4737 = vmatprep.subr.bf16.mxu0 %v5097_v56  ;;  %v5132_v56 = vld [vmem:[#allocation5 + $0x7a8] sm:$0xff]  }
 0x505   :  { %4758 = vmatpush3.bf16.msra.mxu1 %v5096_v46  ;;  %v1050_v46 = vcombine.high %v6287_v16, %v6284_v30 }
 0x506   :  { %4759 = vmatprep.subr.bf16.mxu1 %v5099_v36  ;;  %v5135_v36 = vld [vmem:[#allocation5 + $0x7f0] sm:$0xff]  }
 0x507   :  { %4738 = vmatpush3.bf16.msra.mxu0 %v5098_v22  ;;  %v5134_v22 = vld [vmem:[#allocation5 + $0x730] sm:$0xff]  }
 0x508   :  { %4739 = vmatprep.subr.bf16.mxu0 %v5101_v17  ;;  %v5137_v17 = vld [vmem:[#allocation5 + $0x778] sm:$0xff]  }
 0x509   :  { %4760 = vmatpush3.bf16.msra.mxu1 %v5100_v18  ;;  %v5136_v18 = vld [vmem:[#allocation5 + $0x7b0] sm:$0xff]  }
 0x50a   :  { %4761 = vmatprep.subr.bf16.mxu1 %v5103_v21  ;;  %v1064_v21 = vrot.slane %v1050_v46, %v6133_v52  ;;  %v5150_v46 = vld [vmem:[%s6395_s10 + $0x8] sm:$0xff]  }
 0x50b   :  { %4740 = vmatpush3.bf16.msra.mxu0 %v5102_v37  ;;  %v5138_v37 = vld [vmem:[#allocation5 + $0x738] sm:$0xff]  }
 0x50c   :  { %4741 = vmatprep.subr.bf16.mxu0 %v5105_v59  ;;  %v1068_v30 = vcombine.high %v1064_v21, %v5265_v27  ;;  %v1229_v16 = vpack.c.bf16 %v1064_v21, %v1064_v21 }
 0x50d   :  { %4762 = vmatpush3.bf16.msra.mxu1 %v5104_v34 }
 0x50e   :  { %4763 = vmatprep.subr.bf16.mxu1 %v5107_v39  ;;  %v1231_v59 = vpack.c.bf16 %v1068_v30, %v1068_v30 }
 0x50f   :  { %4742 = vmatpush3.bf16.msra.mxu0 %v5106_v15 }
 0x510   :  { %4771 = vmatprep.subr.bf16.mxu0 %v5109_v38 }
 0x511   :  { %4764 = vmatpush3.bf16.msra.mxu1 %v5108_v25 }
 0x512   :  { %3506 = vmatmul.mubr.bf16.vlgmr.msra.gmra.mrb[28].mxu0 %v1225_v41  ;;  %4793 = vmatprep.subr.bf16.mxu1 %v5111_v57 }
 0x513   :  { %4772 = vmatpush3.bf16.msra.mxu0 %v5110_v12  ;;  %3777 = vmatprep.mubr.bf16.mxu0 %v1230_v7 }
 0x514   :  { %3642 = vmatmul.mubr.bf16.vlgmr.msra.gmra.mrb[36].mxu1 %v1227_v60  ;;  %4773 = vmatprep.subr.bf16.mxu0 %v5113_v58 }
 0x515   :  { %4794 = vmatpush3.bf16.msra.mxu1 %v5112_v51  ;;  %3913 = vmatprep.mubr.bf16.mxu1 %v1232_v29 }
 0x516   :  { %4795 = vmatprep.subr.bf16.mxu1 %v5115_v2 }
 0x517   :  { %4774 = vmatpush3.bf16.msra.mxu0 %v5114_v43 }
 0x518   :  { %4775 = vmatprep.subr.bf16.mxu0 %v5117_v49 }
 0x519   :  { %4796 = vmatpush3.bf16.msra.mxu1 %v5116_v44  ;;  %v4479_v5 = vpop.f32.mrb[4].mxu0 }
 0x51a   :  { %v4480_v11 = vpop.f32.mrb[5].mxu0  ;;  %4797 = vmatprep.subr.bf16.mxu1 %v5119_v62 }
 0x51b   :  { %v4481_v53 = vadd.f32 %v4480_v11, %v4479_v5  ;;  %4776 = vmatpush3.bf16.msra.mxu0 %v5118_v33  ;;  %v4482_v19 = vpop.f32.mrb[6].mxu0  ;;  %v4501_v32 = vpop.f32.mrb[12].mxu1 }
 0x51c   :  { %v4483_v23 = vpop.f32.mrb[7].mxu0  ;;  %v4502_v54 = vpop.f32.mrb[13].mxu1  ;;  %4777 = vmatprep.subr.bf16.mxu0 %v5121_v42  ;;  %v5143_v19 = vld [vmem:[%s6393_s8 + $0x10] sm:$0xff]  }
 0x51d   :  { %v4503_v61 = vadd.f32 %v4502_v54, %v4501_v32  ;;  %4798 = vmatpush3.bf16.msra.mxu1 %v5120_v28  ;;  %v4504_v31 = vpop.f32.mrb[14].mxu1  ;;  %v3921_v14 = vsel %vm497_vm9, %v4481_v53, 0.0  ;;  %v5142_v53 = vld [vmem:[%s6393_s8 + $0x8] sm:$0xff]   ;;  %v5144_v32 = vld [vmem:[%s6393_s8 + $0x18] sm:$0xff]  }
 0x51e   :  { %v4505_v4 = vpop.f32.mrb[15].mxu1  ;;  %4799 = vmatprep.subr.bf16.mxu1 %v5123_v6  ;;  %v5141_v6 = vld [vmem:[%s6393_s8] sm:$0xff]  }
 0x51f   :  { %v3922_v45 = vsel %vm497_vm9, %v4503_v61, 0.0  ;;  %4778 = vmatpush3.bf16.msra.mxu0 %v5122_v9 }
 0x520   :  { %v3923_v47 = vadd.f32 %v3922_v45, %v3921_v14  ;;  %4779 = vmatprep.subr.bf16.mxu0 %v5125_v3 }
 0x521   :  { %4800 = vmatpush3.bf16.msra.mxu1 %v5124_v20 }
 0x522   :  { %4801 = vmatprep.subr.bf16.mxu1 %v5127_v1 }
 0x523   :  { %4780 = vmatpush3.bf16.msra.mxu0 %v5126_v63 }
 0x524   :  { %4781 = vmatprep.subr.bf16.mxu0 %v5129_v0 }
 0x525   :  { %4802 = vmatpush3.bf16.msra.mxu1 %v5128_v40  ;;  %v5145_v40 = vld [vmem:[%s6393_s8 + $0x20] sm:$0xff]  }
 0x526   :  { %4803 = vmatprep.subr.bf16.mxu1 %v5131_v13  ;;  %v5146_v13 = vld [vmem:[%s6393_s8 + $0x28] sm:$0xff]  }
 0x527   :  { %4782 = vmatpush3.bf16.msra.mxu0 %v5130_v10  ;;  %v5147_v10 = vld [vmem:[%s6393_s8 + $0x30] sm:$0xff]  }
 0x528   :  { %4783 = vmatprep.subr.bf16.mxu0 %v5133_v50  ;;  %v5148_v50 = vld [vmem:[%s6393_s8 + $0x38] sm:$0xff]  }
 0x529   :  { %4804 = vmatpush3.bf16.msra.mxu1 %v5132_v56  ;;  %v5149_v56 = vld [vmem:[%s6395_s10] sm:$0xff]  }
 0x52a   :  { %4805 = vmatprep.subr.bf16.mxu1 %v5135_v36 }
 0x52b   :  { %4784 = vmatpush3.bf16.msra.mxu0 %v5134_v22 }
 0x52c   :  { %4785 = vmatprep.subr.bf16.mxu0 %v5137_v17 }
 0x52d   :  { %4806 = vmatpush3.bf16.msra.mxu1 %v5136_v18 }
 0x52e   :  { %4807 = vmatprep.subr.bf16.mxu1 %v5139_v35 }
 0x52f   :  { %4786 = vmatpush3.bf16.msra.mxu0 %v5138_v37 }
 0x530   :  { %4829 = vmatprep.subr.bf16.mxu0 %v5265_v27 }
 0x531   :  { %4808 = vmatpush3.bf16.msra.mxu1 %v5140_v55 }
 0x532   :  { %3778 = vmatmul.mubr.bf16.vlgmr.msra.gmra.mrb[32].mxu0 %v1229_v16  ;;  %4849 = vmatprep.subr.bf16.mxu1 %v5265_v27 }
 0x533   :  { %4830 = vmatpush3.bf16.msra.mxu0 %v5141_v6  ;;  %4845 = vmatprep.mubr.msk.bf16.mxu0 %vm5266_vm12, %v5265_v27 }
 0x534   :  { %3914 = vmatmul.mubr.bf16.vlgmr.msra.gmra.mrb[40].mxu1 %v1231_v59  ;;  %4831 = vmatprep.subr.bf16.mxu0 %v5265_v27 }
 0x535   :  { %4857 = vmatprep.mubr.msk.bf16.mxu1 %vm5266_vm12, %v5265_v27  ;;  %4850 = vmatpush3.bf16.msra.mxu1 %v5149_v56  ;;  %v5152_v56 = vld [vmem:[%s6395_s10 + $0x18] sm:$0xff]  }
 0x536   :  { %4851 = vmatprep.subr.bf16.mxu1 %v5265_v27 }
 0x537   :  { %4832 = vmatpush3.bf16.msra.mxu0 %v5142_v53 }
 0x538   :  { %4833 = vmatprep.subr.bf16.mxu0 %v5265_v27 }
 0x539   :  { %v4523_v34 = vpop.f32.mrb[8].mxu0  ;;  %4852 = vmatpush3.bf16.msra.mxu1 %v5150_v46  ;;  %v4448_v46 = vld [vmem:[%s6394_s9] ss:$0 sm:$0xff] }
 0x53a   :  { %v4524_v52 = vpop.f32.mrb[9].mxu0  ;;  %4853 = vmatprep.subr.bf16.mxu1 %v5265_v27 }
 0x53b   :  { %v4525_v39 = vadd.f32 %v4524_v52, %v4523_v34  ;;  %v4526_v8 = vpop.f32.mrb[10].mxu0  ;;  %v4545_v15 = vpop.f32.mrb[16].mxu1  ;;  %4834 = vmatpush3.bf16.msra.mxu0 %v5143_v19 }
 0x53c   :  { %v4527_v26 = vpop.f32.mrb[11].mxu0  ;;  %v4546_v38 = vpop.f32.mrb[17].mxu1  ;;  %4835 = vmatprep.subr.bf16.mxu0 %v5265_v27 }
 0x53d   :  { %v3924_v25 = vsel %vm497_vm9, %v4525_v39, 0.0  ;;  %v4547_v48 = vadd.f32 %v4546_v38, %v4545_v15  ;;  %v4548_v57 = vpop.f32.mrb[18].mxu1 }
 0x53e   :  { %v3925_v12 = vadd.f32 %v3924_v25, %v3923_v47  ;;  %v4549_v24 = vpop.f32.mrb[19].mxu1 }
 0x53f   :  { %v3926_v41 = vsel %vm497_vm9, %v4547_v48, 0.0  ;;  %4836 = vmatpush3.bf16.msra.mxu0 %v5144_v32 }
 0x540   :  { %v3927_v58 = vadd.f32 %v3926_v41, %v3925_v12  ;;  %4837 = vmatprep.subr.bf16.mxu0 %v5265_v27 }
 0x543   :  { %4838 = vmatpush3.bf16.msra.mxu0 %v5145_v40 }
 0x544   :  { %4839 = vmatprep.subr.bf16.mxu0 %v5265_v27 }
 0x547   :  { %4840 = vmatpush3.bf16.msra.mxu0 %v5146_v13 }
 0x548   :  { %4841 = vmatprep.subr.bf16.mxu0 %v5265_v27 }
 0x54b   :  { %4842 = vmatpush3.bf16.msra.mxu0 %v5147_v10 }
 0x54c   :  { %4843 = vmatprep.subr.bf16.mxu0 %v5265_v27 }
 0x54f   :  { %4844 = vmatpush3.bf16.msra.mxu0 %v5148_v50  ;;  %v5151_v50 = vld [vmem:[%s6395_s10 + $0x10] sm:$0xff]   ;;  %s4165_s10 = sshll.u32 %s5267_s22, 4  ;;  %s4166_s10 = int_to_ptr.vmem [resolvable:$true] %s4165_s10 }
 0x550   :  { %4854 = vmatpush3.bf16.msra.mxu1 %v5151_v50  ;;  %s5221_s9 = scalar_lea.vmem %s4166_s10, 32  ;;  %p5226_p11 = scmp.lt.s32.totalorder %s4166_s10, %s4166_s10 }
 0x551   :  { %4855 = vmatprep.subr.bf16.mxu1 %v5265_v27  ;;  %v4457_v27 = vld [vmem:[%s6396_s11] ss:$0 sm:$0xff]  ;;  %p5222_p10 = scmp.ne.s32.totalorder %s4166_s10, %s5221_s9  ;;  %p5227_p12 = scmp.lt.s32.totalorder %s5221_s9, %s5221_s9 }
 0x553   :  { %p5228_p13 = por %p5227_p12, %p5226_p11 }
 0x554   :  { %4856 = vmatpush3.bf16.msra.mxu1 %v5152_v56 }
 0x555   :  { %p5229_p0 = pnand %p5228_p13, %p5222_p10 }
 0x559   :  { %v4567_v7 = vpop.f32.mrb[12].mxu0 }
 0x55a   :  { %v4568_v51 = vpop.f32.mrb[13].mxu0 }
 0x55b   :  { %v4569_v60 = vadd.f32 %v4568_v51, %v4567_v7  ;;  %v4570_v2 = vpop.f32.mrb[14].mxu0  ;;  %v4589_v29 = vpop.f32.mrb[20].mxu1 }
 0x55c   :  { %v4571_v43 = vpop.f32.mrb[15].mxu0  ;;  %v4590_v49 = vpop.f32.mrb[21].mxu1 }
 0x55d   :  { %v3928_v44 = vsel %vm497_vm9, %v4569_v60, 0.0  ;;  %v4591_v62 = vadd.f32 %v4590_v49, %v4589_v29  ;;  %v4592_v33 = vpop.f32.mrb[22].mxu1 }
 0x55e   :  { %v3929_v42 = vadd.f32 %v3928_v44, %v3927_v58  ;;  %v4593_v5 = vpop.f32.mrb[23].mxu1 }
 0x55f   :  { %v3930_v28 = vsel %vm497_vm9, %v4591_v62, 0.0 }
 0x560   :  { %v3931_v11 = vadd.f32 %v3930_v28, %v3929_v42 }
 0x579   :  { %v4611_v9 = vpop.f32.mrb[16].mxu0 }
 0x57a   :  { %v4612_v23 = vpop.f32.mrb[17].mxu0 }
 0x57b   :  { %v4613_v54 = vadd.f32 %v4612_v23, %v4611_v9  ;;  %v4614_v3 = vpop.f32.mrb[18].mxu0  ;;  %v4633_v61 = vpop.f32.mrb[24].mxu1 }
 0x57c   :  { %v4615_v31 = vpop.f32.mrb[19].mxu0  ;;  %v4634_v20 = vpop.f32.mrb[25].mxu1 }
 0x57d   :  { %v3932_v4 = vsel %vm497_vm9, %v4613_v54, 0.0  ;;  %v4635_v1 = vadd.f32 %v4634_v20, %v4633_v61  ;;  %v4636_v14 = vpop.f32.mrb[26].mxu1 }
 0x57e   :  { %v3933_v45 = vadd.f32 %v3932_v4, %v3931_v11  ;;  %v4637_v63 = vpop.f32.mrb[27].mxu1 }
 0x57f   :  { %v3934_v47 = vsel %vm497_vm9, %v4635_v1, 0.0 }
 0x580   :  { %v3935_v0 = vadd.f32 %v3934_v47, %v3933_v45  ;;  %v4447_v47 = vld [vmem:[#allocation7] ss:$0 sm:$0xff] }
 0x5a5   :  { %v4655_v36 = vpop.f32.mrb[20].mxu0 }
 0x5a6   :  { %v4656_v22 = vpop.f32.mrb[21].mxu0 }
 0x5a7   :  { %v4657_v17 = vadd.f32 %v4656_v22, %v4655_v36  ;;  %v4658_v18 = vpop.f32.mrb[22].mxu0  ;;  %v4677_v35 = vpop.f32.mrb[28].mxu1 }
 0x5a8   :  { %v4659_v21 = vpop.f32.mrb[23].mxu0  ;;  %v4678_v37 = vpop.f32.mrb[29].mxu1 }
 0x5a9   :  { %v3936_v55 = vsel %vm497_vm9, %v4657_v17, 0.0  ;;  %v4679_v30 = vadd.f32 %v4678_v37, %v4677_v35  ;;  %v4680_v16 = vpop.f32.mrb[30].mxu1 }
 0x5aa   :  { %v3937_v59 = vadd.f32 %v3936_v55, %v3935_v0  ;;  %v4681_v34 = vpop.f32.mrb[31].mxu1 }
 0x5ab   :  { %v3938_v52 = vsel %vm497_vm9, %v4679_v30, 0.0 }
 0x5ac   :  { %v3939_v39 = vadd.f32 %v3938_v52, %v3937_v59 }
 0x5c5   :  { %v4699_v8 = vpop.f32.mrb[24].mxu0 }
 0x5c6   :  { %v4700_v15 = vpop.f32.mrb[25].mxu0 }
 0x5c7   :  { %v4701_v26 = vadd.f32 %v4700_v15, %v4699_v8  ;;  %v4702_v38 = vpop.f32.mrb[26].mxu0  ;;  %v4721_v25 = vpop.f32.mrb[32].mxu1 }
 0x5c8   :  { %v4703_v48 = vpop.f32.mrb[27].mxu0  ;;  %v4722_v57 = vpop.f32.mrb[33].mxu1 }
 0x5c9   :  { %v3940_v12 = vsel %vm497_vm9, %v4701_v26, 0.0  ;;  %v4723_v24 = vadd.f32 %v4722_v57, %v4721_v25  ;;  %v4724_v41 = vpop.f32.mrb[34].mxu1 }
 0x5ca   :  { %v3941_v58 = vadd.f32 %v3940_v12, %v3939_v39  ;;  %v4725_v7 = vpop.f32.mrb[35].mxu1 }
 0x5cb   :  { %v3942_v51 = vsel %vm497_vm9, %v4723_v24, 0.0 }
 0x5cc   :  { %v3943_v60 = vadd.f32 %v3942_v51, %v3941_v58 }
 0x5e5   :  { %v4743_v2 = vpop.f32.mrb[28].mxu0 }
 0x5e6   :  { %v4744_v29 = vpop.f32.mrb[29].mxu0 }
 0x5e7   :  { %v4745_v43 = vadd.f32 %v4744_v29, %v4743_v2  ;;  %v4746_v49 = vpop.f32.mrb[30].mxu0  ;;  %v4765_v44 = vpop.f32.mrb[36].mxu1 }
 0x5e8   :  { %v4747_v62 = vpop.f32.mrb[31].mxu0  ;;  %v4766_v33 = vpop.f32.mrb[37].mxu1 }
 0x5e9   :  { %v3944_v42 = vsel %vm497_vm9, %v4745_v43, 0.0  ;;  %v4767_v5 = vadd.f32 %v4766_v33, %v4765_v44  ;;  %v4768_v28 = vpop.f32.mrb[38].mxu1 }
 0x5ea   :  { %v3945_v11 = vadd.f32 %v3944_v42, %v3943_v60  ;;  %v4769_v6 = vpop.f32.mrb[39].mxu1 }
 0x5eb   :  { %v3946_v53 = vsel %vm497_vm9, %v4767_v5, 0.0 }
 0x5ec   :  { %v3947_v19 = vadd.f32 %v3946_v53, %v3945_v11 }
 0x605   :  { %v4787_v32 = vpop.f32.mrb[32].mxu0 }
 0x606   :  { %v4788_v9 = vpop.f32.mrb[33].mxu0 }
 0x607   :  { %v4789_v23 = vadd.f32 %v4788_v9, %v4787_v32  ;;  %v4790_v54 = vpop.f32.mrb[34].mxu0  ;;  %v4809_v3 = vpop.f32.mrb[40].mxu1 }
 0x608   :  { %v4791_v61 = vpop.f32.mrb[35].mxu0  ;;  %v4810_v31 = vpop.f32.mrb[41].mxu1 }
 0x609   :  { %v3948_v20 = vsel %vm497_vm9, %v4789_v23, 0.0  ;;  %v4811_v4 = vadd.f32 %v4810_v31, %v4809_v3  ;;  %v4812_v1 = vpop.f32.mrb[42].mxu1 }
 0x60a   :  { %v3949_v14 = vadd.f32 %v3948_v20, %v3947_v19  ;;  %v4813_v45 = vpop.f32.mrb[43].mxu1 }
 0x60b   :  { %v3950_v63 = vsel %vm497_vm9, %v4811_v4, 0.0 }
 0x60c   :  { %v3951_v0 = vadd.f32 %v3950_v63, %v3949_v14 }
 0x60e   :  { %v3959_v40 = vadd.f32 %v4447_v47, %v3951_v0 }
 0x610   :  { %v3960_v13 = vmax.f32 %v3959_v40, 0.0 }
 0x612   :  { %v3961_v10 = vpack.c.bf16 %v3960_v13, %v3960_v13 }
 0x614   :  { %4846 = vmatmul.mubr.bf16.vlgmr.msra.gmra.mrb[36].mxu0 %v3961_v10 }
 0x6e7   :  { %v4067_v36 = vpop.f32.mrb[36].mxu0 }
 0x6e8   :  { %v4068_v22 = vadd.f32 %v4448_v46, %v4067_v36  ;;  %v4847_v17 = vpop.f32.mrb[37].mxu0 }
 0x6e9   :  { %v4070_v18 = vpop.f32.mrb[38].mxu0 }
 0x6ea   :  { %v4073_v35 = vmax.f32 %v4068_v22, 0.0  ;;  %v4848_v21 = vpop.f32.mrb[39].mxu0 }
 0x6ec   :  { %v4074_v37 = vpack.c.bf16 %v4073_v35, %v4073_v35 }
 0x6ee   :  { %4858 = vmatmul.mubr.msk.bf16.vlgmr.msra.gmra.mrb[44].mxu1 %vm4114_vm13, %v4074_v37 }
 0x7c1   :  { %v4152_v55 = vpop.f32.mrb[44].mxu1 }
 0x7c2   :  { %v4153_v30 = vadd.f32 %v4457_v27, %v4152_v55  ;;  %v4859_v16 = vpop.f32.mrb[45].mxu1 }
 0x7c3   :  { %v4155_v59 = vpop.f32.mrb[46].mxu1 }
 0x7c4   :  { %4158 = vst [vmem:[#allocation8] sm:$0x3] %v4153_v30  ;;  %v4860_v34 = vpop.f32.mrb[47].mxu1 }
 0x7c5   :  { %5232 = shalt.err (!%p5229_p0)
}
 0x7c6   :  { %s5233_s11 = scalar_lea.hbm %s6397_s12, 32 }
 0x7c7   :  { %p5234_p1 = scmp.ne.s32.totalorder %s6397_s12, %s5233_s11  ;;  %p5237_p2 = scmp.lt.u32.totalorder %s5233_s11, %s6397_s12 }
 0x7c9   :  { %p5239_p3 = pnand %p5237_p2, %p5234_p1 }
 0x7cb   :  { %5242 = shalt.err (!%p5239_p3)
}
 0x7cc   :  { %4168 = dma.vmem_to_hbm [thread:$0]  %s4166_s10, 32, %s6397_s12, [#allocation4]  }
 0x7cd   :  { %5247 = dma.done.wait [#allocation4], 32  }
 0x7ce   :  { %5248 = vsyncadd [#allocation4], 4294967264 }
 0x7cf   :  { %4172 = vsyncpa [#allocation3], 1 }
 0x7d0   :  { %4173 = vsyncpa [#allocation6], 1 }
 0x7d1   :  { %4174 = vsyncpa [#allocation4], 1 }

</bundles_post_ra>
